<compile_context>
chip_gen: v6e
topology: v6e:2x2x1
jax: 0.10.0
libtpu: 0.0.40
codegen_flags: <defaults>
</compile_context>

<pallas_src>
import jax
import jax.numpy as jnp
from jax.experimental import pallas as pl
from jax.experimental.pallas import tpu as pltpu

NUM_MONTH = 12
NUM_TIME = 6
HIDDEN = 256
HEAD_HIDDEN = 128
NUM_HEADS = NUM_MONTH + NUM_TIME


def mtl_kernel(x_ref,
               w_sh_ref, b_sh_ref,    # fused trunk     (D, 512),   (1, 512)
               w1m_ref, b1m_ref,      # month layer1    (256, 1536),(1, 1536)
               w1t_ref, b1t_ref,      # time  layer1    (256, 768), (1, 768)
               w2m_ref, w2t_ref,      # layer2 weights  (1, 1536),  (1, 768)  [f32]
               b2m_ref, b2t_ref,      # layer2 biases   (1, 12),    (1, 6)    [f32]
               out_ref):              # packed preds    (TB, 18)
    mm_dtype = w_sh_ref.dtype         # bf16 (perf) or f32 (exact) — same kernel
    x = x_ref[...].astype(mm_dtype)

    # Fused shared trunk: one MXU push produces both month & time trunks.
    h = jnp.dot(x, w_sh_ref[...], preferred_element_type=jnp.float32) + b_sh_ref[...]
    h = jnp.maximum(h, 0.0)                                        # (TB, 512) f32
    tb = h.shape[0]

    # ---- Month path: fully retired before the time path starts ----
    h_month = h[:, :HIDDEN].astype(mm_dtype)
    h1m = jnp.maximum(
        jnp.dot(h_month, w1m_ref[...], preferred_element_type=jnp.float32)
        + b1m_ref[...], 0.0)                                       # (TB, 1536) f32
    pm = (h1m * w2m_ref[...]).reshape(tb, NUM_MONTH, HEAD_HIDDEN).sum(axis=-1)
    out_ref[:, :NUM_MONTH] = pm + b2m_ref[...]                     # (TB, 12)

    # ---- Time path ----
    h_time = h[:, HIDDEN:].astype(mm_dtype)
    h1t = jnp.maximum(
        jnp.dot(h_time, w1t_ref[...], preferred_element_type=jnp.float32)
        + b1t_ref[...], 0.0)                                       # (TB, 768) f32
    pt = (h1t * w2t_ref[...]).reshape(tb, NUM_TIME, HEAD_HIDDEN).sum(axis=-1)
    out_ref[:, NUM_MONTH:] = pt + b2t_ref[...]                     # (TB, 6)


def make_params(input_size, key):
    """Deterministic init mimicking nn.Linear's U(-1/sqrt(fan_in), 1/sqrt(fan_in))."""
    def linear(key, fan_in, fan_out):
        kw, kb = jax.random.split(key)
        bound = 1.0 / jnp.sqrt(fan_in)
        w = jax.random.uniform(kw, (fan_in, fan_out), jnp.float32, -bound, bound)
        b = jax.random.uniform(kb, (fan_out,), jnp.float32, -bound, bound)
        return w, b

    keys = jax.random.split(key, 2 + 6 + 12 + 6 + 12)
    it = iter(keys)

    wsm, bsm = linear(next(it), input_size, HIDDEN)
    wst, bst = linear(next(it), input_size, HIDDEN)
    time_l1 = [linear(next(it), HIDDEN, HEAD_HIDDEN) for _ in range(NUM_TIME)]
    month_l1 = [linear(next(it), HIDDEN, HEAD_HIDDEN) for _ in range(NUM_MONTH)]
    time_l2 = [linear(next(it), HEAD_HIDDEN, 1) for _ in range(NUM_TIME)]
    month_l2 = [linear(next(it), HEAD_HIDDEN, 1) for _ in range(NUM_MONTH)]

    return dict(wsm=wsm, bsm=bsm, wst=wst, bst=bst,
                time_l1=time_l1, month_l1=month_l1,
                time_l2=time_l2, month_l2=month_l2)


def pack_params(params, matmul_dtype=jnp.bfloat16):
    """Fuse per-head weights into the stacked layouts the kernel expects.

    Only the MXU-bound matmul weights get `matmul_dtype`; biases and the
    layer-2 (VPU) weights stay f32.
    """
    w_sh = jnp.concatenate([params["wsm"], params["wst"]], axis=1).astype(matmul_dtype)
    b_sh = jnp.concatenate([params["bsm"], params["bst"]], axis=0)[None, :]

    w1m = jnp.concatenate([w for w, _ in params["month_l1"]], axis=1).astype(matmul_dtype)
    b1m = jnp.concatenate([b for _, b in params["month_l1"]], axis=0)[None, :]
    w1t = jnp.concatenate([w for w, _ in params["time_l1"]], axis=1).astype(matmul_dtype)
    b1t = jnp.concatenate([b for _, b in params["time_l1"]], axis=0)[None, :]

    # Dense layer-2 weights, flattened so head i occupies lanes [i*128,(i+1)*128).
    w2m = jnp.concatenate([w[:, 0] for w, _ in params["month_l2"]])[None, :]   # (1, 1536)
    w2t = jnp.concatenate([w[:, 0] for w, _ in params["time_l2"]])[None, :]    # (1, 768)
    b2m = jnp.concatenate([b for _, b in params["month_l2"]])[None, :]         # (1, 12)
    b2t = jnp.concatenate([b for _, b in params["time_l2"]])[None, :]          # (1, 6)

    return dict(w_sh=w_sh, b_sh=b_sh, w1m=w1m, b1m=b1m, w1t=w1t, b1t=b1t,
                w2m=w2m, w2t=w2t, b2m=b2m, b2t=b2t)


def mtl_forward(x, packed, block_b=256):
    """Run the fused MTL forward pass. Returns 12 month + 6 time (B, 1) preds."""
    B, D = x.shape
    block_b = max(8, (block_b // 8) * 8)
    TB = min(block_b, ((B + 7) // 8) * 8)          # batch tile, multiple of 8
    grid = (pl.cdiv(B, TB),)                       # ragged tail handled by Pallas

    weights = (packed["w_sh"], packed["b_sh"],
               packed["w1m"], packed["b1m"],
               packed["w1t"], packed["b1t"],
               packed["w2m"], packed["w2t"],
               packed["b2m"], packed["b2t"])

    def resident(a):
        # Constant index_map -> weights stay in VMEM across all grid steps.
        return pl.BlockSpec(a.shape, lambda i: (0, 0))

    out = pl.pallas_call(
        mtl_kernel,
        out_shape=jax.ShapeDtypeStruct((B, NUM_HEADS), jnp.float32),
        grid=grid,
        in_specs=[pl.BlockSpec((TB, D), lambda i: (i, 0))]
                 + [resident(w) for w in weights],
        out_specs=pl.BlockSpec((TB, NUM_HEADS), lambda i: (i, 0)),
        compiler_params=pltpu.CompilerParams(dimension_semantics=("parallel",)),
    )(x, *weights)

    # Match PyTorch return: 12 month preds then 6 time preds, each (B, 1).
    return [out[:, i:i + 1] for i in range(NUM_HEADS)]


def reference_forward(x, params):
    relu = lambda v: jnp.maximum(v, 0.0)
    x_month = relu(x @ params["wsm"] + params["bsm"])
    x_time = relu(x @ params["wst"] + params["bst"])
    time_h = [relu(x_time @ w + b) for (w, b) in params["time_l1"]]
    month_h = [relu(x_month @ w + b) for (w, b) in params["month_l1"]]
    time_p = [h @ w + b for (w, b), h in zip(params["time_l2"], time_h)]
    month_p = [h @ w + b for (w, b), h in zip(params["month_l2"], month_h)]
    return month_p + time_p


if __name__ == "__main__":
    key = jax.random.PRNGKey(0)
    k_param, k_x, k_x2 = jax.random.split(key, 3)

    B, input_size = 2, 32
    params = make_params(input_size, k_param)
    packed_f32 = pack_params(params, matmul_dtype=jnp.float32)   # exact path
    packed_bf16 = pack_params(params, matmul_dtype=jnp.bfloat16)  # perf path

    # Tiny-batch check (matches the module's typical usage).
    x = jax.random.normal(k_x, (B, input_size), jnp.float32)
    refs = reference_forward(x, params)

    outs = [jax.block_until_ready(o) for o in mtl_forward(x, packed_f32)]
    for o, r in zip(outs, refs):
        assert o.shape == (B, 1)
        assert jnp.allclose(o, r, atol=1e-4, rtol=1e-4), (o, r)

    outs_bf = [jax.block_until_ready(o) for o in mtl_forward(x, packed_bf16)]
    for o, r in zip(outs_bf, refs):
        assert o.shape == (B, 1)
        assert jnp.allclose(o, r, atol=5e-2, rtol=5e-2), (o, r)

    # Larger, non-multiple-of-tile batch: exercises the ragged-tail grid,
    # resident weights across steps, and both matmul dtypes.
    B2 = 300
    x2 = jax.random.normal(k_x2, (B2, input_size), jnp.float32)
    refs2 = reference_forward(x2, params)

    outs2 = [jax.block_until_ready(o)
             for o in mtl_forward(x2, packed_f32, block_b=128)]
    for o, r in zip(outs2, refs2):
        assert o.shape == (B2, 1)
        assert jnp.allclose(o, r, atol=1e-4, rtol=1e-4), (o, r)

    outs2_bf = [jax.block_until_ready(o)
                for o in mtl_forward(x2, packed_bf16, block_b=128)]
    for o, r in zip(outs2_bf, refs2):
        assert o.shape == (B2, 1)
        assert jnp.allclose(o, r, atol=5e-2, rtol=5e-2), (o, r)

    print("KERNEL_OK")
</pallas_src>

<mosaic_0001>
module attributes {stable_mosaic.version = 11 : i64} {
  func.func @mtl_kernel(%arg0: i32, %arg1: memref<8x32xf32, #tpu.memory_space<vmem>>, %arg2: memref<32x512xf32, #tpu.memory_space<vmem>>, %arg3: memref<1x512xf32, #tpu.memory_space<vmem>>, %arg4: memref<256x1536xf32, #tpu.memory_space<vmem>>, %arg5: memref<1x1536xf32, #tpu.memory_space<vmem>>, %arg6: memref<256x768xf32, #tpu.memory_space<vmem>>, %arg7: memref<1x768xf32, #tpu.memory_space<vmem>>, %arg8: memref<1x1536xf32, #tpu.memory_space<vmem>>, %arg9: memref<1x768xf32, #tpu.memory_space<vmem>>, %arg10: memref<1x12xf32, #tpu.memory_space<vmem>>, %arg11: memref<1x6xf32, #tpu.memory_space<vmem>>, %arg12: memref<8x18xf32, #tpu.memory_space<vmem>>) attributes {dimension_semantics = [#tpu.dimension_semantics<parallel>], iteration_bounds = array<i64: 1>, scalar_prefetch = 0 : i64, scratch_operands = 0 : i64, tpu.core_type = #tpu.core_type<tc>, window_params = [{transform_indices = @transform_0, window_bounds = array<i64: 8, 32>}, {pipeline_mode = #tpu.pipeline_mode<synchronous>, transform_indices = @transform_1, window_bounds = array<i64: 32, 512>}, {pipeline_mode = #tpu.pipeline_mode<synchronous>, transform_indices = @transform_2, window_bounds = array<i64: 1, 512>}, {pipeline_mode = #tpu.pipeline_mode<synchronous>, transform_indices = @transform_3, window_bounds = array<i64: 256, 1536>}, {pipeline_mode = #tpu.pipeline_mode<synchronous>, transform_indices = @transform_4, window_bounds = array<i64: 1, 1536>}, {pipeline_mode = #tpu.pipeline_mode<synchronous>, transform_indices = @transform_5, window_bounds = array<i64: 256, 768>}, {pipeline_mode = #tpu.pipeline_mode<synchronous>, transform_indices = @transform_6, window_bounds = array<i64: 1, 768>}, {pipeline_mode = #tpu.pipeline_mode<synchronous>, transform_indices = @transform_7, window_bounds = array<i64: 1, 1536>}, {pipeline_mode = #tpu.pipeline_mode<synchronous>, transform_indices = @transform_8, window_bounds = array<i64: 1, 768>}, {pipeline_mode = #tpu.pipeline_mode<synchronous>, transform_indices = @transform_9, window_bounds = array<i64: 1, 12>}, {pipeline_mode = #tpu.pipeline_mode<synchronous>, transform_indices = @transform_10, window_bounds = array<i64: 1, 6>}, {transform_indices = @transform_11, window_bounds = array<i64: 8, 18>}]} {
    %c0 = arith.constant 0 : index
    %c0_0 = arith.constant 0 : index
    %0 = vector.load %arg1[%c0, %c0_0] : memref<8x32xf32, #tpu.memory_space<vmem>>, vector<8x32xf32>
    %c0_1 = arith.constant 0 : index
    %c0_2 = arith.constant 0 : index
    %1 = vector.load %arg2[%c0_1, %c0_2] : memref<32x512xf32, #tpu.memory_space<vmem>>, vector<32x512xf32>
    %cst = arith.constant dense<0.000000e+00> : vector<8x512xf32>
    %2 = tpu.matmul %0, %1, %cst {dimension_numbers = #tpu.dot_dimension_numbers<[1], [0], [0], [1], [0, 0, 1, 1], [], []>} : vector<8x32xf32>, vector<32x512xf32>, vector<8x512xf32> -> vector<8x512xf32>
    %c0_3 = arith.constant 0 : index
    %c0_4 = arith.constant 0 : index
    %3 = vector.load %arg3[%c0_3, %c0_4] : memref<1x512xf32, #tpu.memory_space<vmem>>, vector<1x512xf32>
    %4 = vector.broadcast %3 : vector<1x512xf32> to vector<8x512xf32>
    %5 = arith.addf %2, %4 : vector<8x512xf32>
    %cst_5 = arith.constant 0.000000e+00 : f32
    %6 = vector.broadcast %cst_5 : f32 to vector<8x512xf32>
    %7 = arith.maximumf %5, %6 : vector<8x512xf32>
    %8 = vector.extract_strided_slice %7 {offsets = [0, 0], sizes = [8, 256], strides = [1, 1]} : vector<8x512xf32> to vector<8x256xf32>
    %c0_6 = arith.constant 0 : index
    %c0_7 = arith.constant 0 : index
    %9 = vector.load %arg4[%c0_6, %c0_7] : memref<256x1536xf32, #tpu.memory_space<vmem>>, vector<256x1536xf32>
    %cst_8 = arith.constant dense<0.000000e+00> : vector<8x1536xf32>
    %10 = tpu.matmul %8, %9, %cst_8 {dimension_numbers = #tpu.dot_dimension_numbers<[1], [0], [0], [1], [0, 0, 1, 1], [], []>} : vector<8x256xf32>, vector<256x1536xf32>, vector<8x1536xf32> -> vector<8x1536xf32>
    %c0_9 = arith.constant 0 : index
    %c0_10 = arith.constant 0 : index
    %11 = vector.load %arg5[%c0_9, %c0_10] : memref<1x1536xf32, #tpu.memory_space<vmem>>, vector<1x1536xf32>
    %12 = vector.broadcast %11 : vector<1x1536xf32> to vector<8x1536xf32>
    %13 = arith.addf %10, %12 : vector<8x1536xf32>
    %cst_11 = arith.constant 0.000000e+00 : f32
    %14 = vector.broadcast %cst_11 : f32 to vector<8x1536xf32>
    %15 = arith.maximumf %13, %14 : vector<8x1536xf32>
    %c0_12 = arith.constant 0 : index
    %c0_13 = arith.constant 0 : index
    %16 = vector.load %arg8[%c0_12, %c0_13] : memref<1x1536xf32, #tpu.memory_space<vmem>>, vector<1x1536xf32>
    %17 = vector.broadcast %16 : vector<1x1536xf32> to vector<8x1536xf32>
    %18 = arith.mulf %15, %17 : vector<8x1536xf32>
    %19 = vector.shape_cast %18 : vector<8x1536xf32> to vector<8x12x128xf32>
    %cst_14 = arith.constant dense<0.000000e+00> : vector<8x12xf32>
    %20 = vector.multi_reduction <add>, %19, %cst_14 [2] : vector<8x12x128xf32> to vector<8x12xf32>
    %c0_15 = arith.constant 0 : index
    %c0_16 = arith.constant 0 : index
    %21 = vector.load %arg10[%c0_15, %c0_16] : memref<1x12xf32, #tpu.memory_space<vmem>>, vector<1x12xf32>
    %22 = vector.broadcast %21 : vector<1x12xf32> to vector<8x12xf32>
    %23 = arith.addf %20, %22 : vector<8x12xf32>
    %c0_17 = arith.constant 0 : index
    %c0_18 = arith.constant 0 : index
    %24 = vector.load %arg12[%c0_17, %c0_18] : memref<8x18xf32, #tpu.memory_space<vmem>>, vector<8x12xf32>
    tpu.vector_store %arg12[%c0_17, %c0_18], %23 {strides = array<i32>} : memref<8x18xf32, #tpu.memory_space<vmem>>, vector<8x12xf32>,
    %25 = vector.extract_strided_slice %7 {offsets = [0, 256], sizes = [8, 256], strides = [1, 1]} : vector<8x512xf32> to vector<8x256xf32>
    %c0_19 = arith.constant 0 : index
    %c0_20 = arith.constant 0 : index
    %26 = vector.load %arg6[%c0_19, %c0_20] : memref<256x768xf32, #tpu.memory_space<vmem>>, vector<256x768xf32>
    %cst_21 = arith.constant dense<0.000000e+00> : vector<8x768xf32>
    %27 = tpu.matmul %25, %26, %cst_21 {dimension_numbers = #tpu.dot_dimension_numbers<[1], [0], [0], [1], [0, 0, 1, 1], [], []>} : vector<8x256xf32>, vector<256x768xf32>, vector<8x768xf32> -> vector<8x768xf32>
    %c0_22 = arith.constant 0 : index
    %c0_23 = arith.constant 0 : index
    %28 = vector.load %arg7[%c0_22, %c0_23] : memref<1x768xf32, #tpu.memory_space<vmem>>, vector<1x768xf32>
    %29 = vector.broadcast %28 : vector<1x768xf32> to vector<8x768xf32>
    %30 = arith.addf %27, %29 : vector<8x768xf32>
    %cst_24 = arith.constant 0.000000e+00 : f32
    %31 = vector.broadcast %cst_24 : f32 to vector<8x768xf32>
    %32 = arith.maximumf %30, %31 : vector<8x768xf32>
    %c0_25 = arith.constant 0 : index
    %c0_26 = arith.constant 0 : index
    %33 = vector.load %arg9[%c0_25, %c0_26] : memref<1x768xf32, #tpu.memory_space<vmem>>, vector<1x768xf32>
    %34 = vector.broadcast %33 : vector<1x768xf32> to vector<8x768xf32>
    %35 = arith.mulf %32, %34 : vector<8x768xf32>
    %36 = vector.shape_cast %35 : vector<8x768xf32> to vector<8x6x128xf32>
    %cst_27 = arith.constant dense<0.000000e+00> : vector<8x6xf32>
    %37 = vector.multi_reduction <add>, %36, %cst_27 [2] : vector<8x6x128xf32> to vector<8x6xf32>
    %c0_28 = arith.constant 0 : index
    %c0_29 = arith.constant 0 : index
    %38 = vector.load %arg11[%c0_28, %c0_29] : memref<1x6xf32, #tpu.memory_space<vmem>>, vector<1x6xf32>
    %39 = vector.broadcast %38 : vector<1x6xf32> to vector<8x6xf32>
    %40 = arith.addf %37, %39 : vector<8x6xf32>
    %c0_30 = arith.constant 0 : index
    %c12 = arith.constant 12 : index
    %41 = vector.load %arg12[%c0_30, %c12] : memref<8x18xf32, #tpu.memory_space<vmem>>, vector<8x6xf32>
    tpu.vector_store %arg12[%c0_30, %c12], %40 {strides = array<i32>} : memref<8x18xf32, #tpu.memory_space<vmem>>, vector<8x6xf32>,
    return
  }
  func.func @transform_0(%arg0: i32) -> (i32, i32) {
    %c0_i32 = arith.constant 0 : i32
    %c0_i32_0 = arith.constant 0 : i32
    return %arg0, %c0_i32 : i32, i32
  }
  func.func @transform_1(%arg0: i32) -> (i32, i32) {
    %c0_i32 = arith.constant 0 : i32
    %c0_i32_0 = arith.constant 0 : i32
    %c0_i32_1 = arith.constant 0 : i32
    return %c0_i32, %c0_i32_0 : i32, i32
  }
  func.func @transform_2(%arg0: i32) -> (i32, i32) {
    %c0_i32 = arith.constant 0 : i32
    %c0_i32_0 = arith.constant 0 : i32
    %c0_i32_1 = arith.constant 0 : i32
    return %c0_i32, %c0_i32_0 : i32, i32
  }
  func.func @transform_3(%arg0: i32) -> (i32, i32) {
    %c0_i32 = arith.constant 0 : i32
    %c0_i32_0 = arith.constant 0 : i32
    %c0_i32_1 = arith.constant 0 : i32
    return %c0_i32, %c0_i32_0 : i32, i32
  }
  func.func @transform_4(%arg0: i32) -> (i32, i32) {
    %c0_i32 = arith.constant 0 : i32
    %c0_i32_0 = arith.constant 0 : i32
    %c0_i32_1 = arith.constant 0 : i32
    return %c0_i32, %c0_i32_0 : i32, i32
  }
  func.func @transform_5(%arg0: i32) -> (i32, i32) {
    %c0_i32 = arith.constant 0 : i32
    %c0_i32_0 = arith.constant 0 : i32
    %c0_i32_1 = arith.constant 0 : i32
    return %c0_i32, %c0_i32_0 : i32, i32
  }
  func.func @transform_6(%arg0: i32) -> (i32, i32) {
    %c0_i32 = arith.constant 0 : i32
    %c0_i32_0 = arith.constant 0 : i32
    %c0_i32_1 = arith.constant 0 : i32
    return %c0_i32, %c0_i32_0 : i32, i32
  }
  func.func @transform_7(%arg0: i32) -> (i32, i32) {
    %c0_i32 = arith.constant 0 : i32
    %c0_i32_0 = arith.constant 0 : i32
    %c0_i32_1 = arith.constant 0 : i32
    return %c0_i32, %c0_i32_0 : i32, i32
  }
  func.func @transform_8(%arg0: i32) -> (i32, i32) {
    %c0_i32 = arith.constant 0 : i32
    %c0_i32_0 = arith.constant 0 : i32
    %c0_i32_1 = arith.constant 0 : i32
    return %c0_i32, %c0_i32_0 : i32, i32
  }
  func.func @transform_9(%arg0: i32) -> (i32, i32) {
    %c0_i32 = arith.constant 0 : i32
    %c0_i32_0 = arith.constant 0 : i32
    %c0_i32_1 = arith.constant 0 : i32
    return %c0_i32, %c0_i32_0 : i32, i32
  }
  func.func @transform_10(%arg0: i32) -> (i32, i32) {
    %c0_i32 = arith.constant 0 : i32
    %c0_i32_0 = arith.constant 0 : i32
    %c0_i32_1 = arith.constant 0 : i32
    return %c0_i32, %c0_i32_0 : i32, i32
  }
  func.func @transform_11(%arg0: i32) -> (i32, i32) {
    %c0_i32 = arith.constant 0 : i32
    %c0_i32_0 = arith.constant 0 : i32
    return %arg0, %c0_i32 : i32, i32
  }
}

</mosaic_0001>

<bundles_post_ra>
// kernel: tpu_custom_call.1
= control target key start
LH: loop header
LB: loop body
LE: loop exit
PB: predicated region body
PF: predicated region fallthrough
CT: control target
= control target key end

     0   :  { %16 = vsyncpa [#allocation3], 0  ;;  %s3165_s0 = inlined_call_operand.hbm [shape: f32[2,32], index: 0, kind: input, shape index: {}]   ;;  %s3166_s1 = inlined_call_operand.hbm [shape: f32[32,512], index: 1, kind: input, shape index: {}]   ;;  %s3167_s2 = inlined_call_operand.hbm [shape: f32[1,512], index: 2, kind: input, shape index: {}]   ;;  %s3168_s3 = inlined_call_operand.hbm [shape: f32[256,1536], index: 3, kind: input, shape index: {}]   ;;  %s3169_s4 = inlined_call_operand.hbm [shape: f32[1,1536], index: 4, kind: input, shape index: {}]   ;;  %s3170_s5 = inlined_call_operand.hbm [shape: f32[256,768], index: 5, kind: input, shape index: {}]   ;;  %s3171_s6 = inlined_call_operand.hbm [shape: f32[1,768], index: 6, kind: input, shape index: {}]   ;;  %s3172_s7 = inlined_call_operand.hbm [shape: f32[1,1536], index: 7, kind: input, shape index: {}]   ;;  %s3173_s8 = inlined_call_operand.hbm [shape: f32[1,768], index: 8, kind: input, shape index: {}]   ;;  %s3174_s9 = inlined_call_operand.hbm [shape: f32[1,12], index: 9, kind: input, shape index: {}]   ;;  %s3175_s10 = inlined_call_operand.hbm [shape: f32[1,6], index: 10, kind: input, shape index: {}]   ;;  %s3176_s11 = inlined_call_operand.hbm [shape: f32[2,18], index: 11, kind: output, shape index: {}]  }
   0x1   :  { %17 = vsyncpa [#allocation6], 0 }
   0x2   :  { %18 = vsyncpa [#allocation9], 0 }
   0x3   :  { %19 = vsyncpa [#allocation12], 0 }
   0x4   :  { %20 = vsyncpa [#allocation15], 0 }
   0x5   :  { %21 = vsyncpa [#allocation18], 0 }
   0x6   :  { %22 = vsyncpa [#allocation4], 0 }
   0x7   :  { %27 = vsyncadd [#allocation3], 96  ;;  %s2797_s17 = smov [#allocation5]  }
   0x8   :  { %s40_s18 = sshll.u32 %s2797_s17, 4  ;;  %s41_s18 = int_to_ptr.vmem [resolvable:$true] %s40_s18 }
   0x9   :  { %s2551_s19 = scalar_lea.vmem %s41_s18, 2048  ;;  %p2556_p1 = scmp.lt.s32.totalorder %s41_s18, %s41_s18 }
   0xa   :  { %p2552_p0 = scmp.ne.s32.totalorder %s41_s18, %s2551_s19  ;;  %p2557_p2 = scmp.lt.s32.totalorder %s2551_s19, %s2551_s19 }
   0xc   :  { %p2558_p3 = por %p2557_p2, %p2556_p1 }
   0xe   :  { %p2559_p4 = pnand %p2558_p3, %p2552_p0 }
  0x10   :  { %2562 = shalt.err (!%p2559_p4)
}
  0x11   :  { %s2798_s20 = smov 512   ;;  %s2799_s21 = smov 32  }
  0x12   :  { %46 = dma.hbm_to_vmem [thread:$0]  %s3166_s1, 2048, %s41_s18, [#allocation6], %s2798_s20, %s2798_s20, %s2799_s21  }
  0x13   :  { %s2800_s24 = smov [#allocation8]  }
  0x14   :  { %s62_s25 = sshll.u32 %s2800_s24, 4  ;;  %s63_s25 = int_to_ptr.vmem [resolvable:$true] %s62_s25 }
  0x15   :  { %s2571_s26 = scalar_lea.vmem %s63_s25, 49152  ;;  %p2576_p6 = scmp.lt.s32.totalorder %s63_s25, %s63_s25 }
  0x16   :  { %p2572_p5 = scmp.ne.s32.totalorder %s63_s25, %s2571_s26  ;;  %p2577_p7 = scmp.lt.s32.totalorder %s2571_s26, %s2571_s26 }
  0x18   :  { %p2578_p8 = por %p2577_p7, %p2576_p6 }
  0x1a   :  { %p2579_p9 = pnand %p2578_p8, %p2572_p5 }
  0x1c   :  { %2582 = shalt.err (!%p2579_p9)
}
  0x1d   :  { %s2801_s27 = smov 1536   ;;  %s2802_s28 = smov 96  }
  0x1e   :  { %68 = dma.hbm_to_vmem [thread:$0]  %s3168_s3, 49152, %s63_s25, [#allocation9], %s2801_s27, %s2801_s27, %s2802_s28  }
  0x1f   :  { %s2803_s12 = smov [#allocation11]  }
  0x20   :  { %s84_s13 = sshll.u32 %s2803_s12, 4  ;;  %s85_s13 = int_to_ptr.vmem [resolvable:$true] %s84_s13 }
  0x21   :  { %s2591_s1 = scalar_lea.vmem %s85_s13, 24576  ;;  %p2596_p11 = scmp.lt.s32.totalorder %s85_s13, %s85_s13 }
  0x22   :  { %p2592_p10 = scmp.ne.s32.totalorder %s85_s13, %s2591_s1  ;;  %p2597_p12 = scmp.lt.s32.totalorder %s2591_s1, %s2591_s1 }
  0x24   :  { %p2598_p13 = por %p2597_p12, %p2596_p11 }
  0x26   :  { %p2599_p0 = pnand %p2598_p13, %p2592_p10 }
  0x28   :  { %2602 = shalt.err (!%p2599_p0)
}
  0x29   :  { %s2804_s14 = smov 768   ;;  %s2805_s15 = smov 48  }
  0x2a   :  { %90 = dma.hbm_to_vmem [thread:$0]  %s3170_s5, 24576, %s85_s13, [#allocation12], %s2804_s14, %s2804_s14, %s2805_s15  }
  0x2b   :  { %s2806_s18 = smov [#allocation14]   ;;  %s2807_s3 = smov [#allocation17]  }
  0x2c   :  { %s107_s19 = sshll.u32 %s2806_s18, 4  ;;  %s127_s20 = sshll.u32 %s2807_s3, 4  ;;  %s108_s19 = int_to_ptr.vmem [resolvable:$true] %s107_s19  ;;  %s128_s20 = int_to_ptr.vmem [resolvable:$true] %s127_s20 }
  0x2d   :  { %s2611_s22 = scalar_lea.vmem %s108_s19, 192  ;;  %p2616_p2 = scmp.lt.s32.totalorder %s108_s19, %s108_s19 }
  0x2e   :  { %p2612_p1 = scmp.ne.s32.totalorder %s108_s19, %s2611_s22  ;;  %p2617_p3 = scmp.lt.s32.totalorder %s2611_s22, %s2611_s22 }
  0x30   :  { %p2618_p4 = por %p2617_p3, %p2616_p2 }
  0x32   :  { %p2619_p5 = pnand %p2618_p4, %p2612_p1 }
  0x34   :  { %2622 = shalt.err (!%p2619_p5)
}
  0x35   :  { %110 = dma.hbm_to_vmem [thread:$0]  %s3172_s7, 192, %s108_s19, [#allocation15]  }
  0x36   :  { %s2631_s25 = scalar_lea.vmem %s128_s20, 16  ;;  %s2635_s5 = scalar_lea.vmem %s128_s20, 32 }
  0x37   :  { %p2632_p6 = scmp.ne.s32.totalorder %s128_s20, %s2631_s25  ;;  %p2636_p7 = scmp.lt.s32.totalorder %s128_s20, %s128_s20 }
  0x38   :  { %p2637_p8 = scmp.lt.s32.totalorder %s2635_s5, %s2631_s25 }
  0x3a   :  { %p2638_p9 = por %p2637_p8, %p2636_p7 }
  0x3c   :  { %p2639_p10 = pnand %p2638_p9, %p2632_p6 }
  0x3e   :  { %2642 = shalt.err (!%p2639_p10)
}
  0x3f   :  { %130 = dma.hbm_to_vmem [thread:$0]  %s3174_s9, 16, %s128_s20, [#allocation18]  }
  0x40   :  { %s2808_s28 = smov [#allocation2]  }
  0x41   :  { %s28_s29 = sshll.u32 %s2808_s28, 4  ;;  %s29_s29 = int_to_ptr.vmem [resolvable:$true] %s28_s29 }
  0x42   :  { %s2651_s30 = scalar_lea.vmem %s29_s29, 32  ;;  %s2655_s12 = scalar_lea.vmem %s29_s29, 128 }
  0x43   :  { %p2652_p11 = scmp.ne.s32.totalorder %s29_s29, %s2651_s30  ;;  %p2656_p12 = scmp.lt.s32.totalorder %s29_s29, %s29_s29 }
  0x44   :  { %p2657_p13 = scmp.lt.s32.totalorder %s2655_s12, %s2651_s30 }
  0x46   :  { %p2658_p0 = por %p2657_p13, %p2656_p12 }
  0x48   :  { %p2659_p1 = pnand %p2658_p0, %p2652_p11 }
  0x4a   :  { %2662 = shalt.err (!%p2659_p1)
}
  0x4b   :  { %s2809_s7 = smov 2   ;;  %s2810_s9 = smov [#allocation7]  }
  0x4c   :  { %34 = dma.hbm_to_vmem [thread:$0]  %s3165_s0, 32, %s29_s29, [#allocation3], %s2799_s21, %s2799_s21, %s2809_s7  }
  0x4d   :  { %s53_s14 = sshll.u32 %s2810_s9, 4  ;;  %s2811_s15 = smov [#allocation10]   ;;  %s54_s14 = int_to_ptr.vmem [resolvable:$true] %s53_s14 }
  0x4e   :  { %s75_s16 = sshll.u32 %s2811_s15, 4  ;;  %s2671_s17 = scalar_lea.vmem %s54_s14, 64  ;;  %s76_s16 = int_to_ptr.vmem [resolvable:$true] %s75_s16 }
  0x4f   :  { %p2672_p2 = scmp.ne.s32.totalorder %s54_s14, %s2671_s17  ;;  %p2676_p3 = scmp.lt.s32.totalorder %s54_s14, %s54_s14 }
  0x50   :  { %p2677_p4 = scmp.lt.s32.totalorder %s2671_s17, %s2671_s17 }
  0x52   :  { %p2678_p5 = por %p2677_p4, %p2676_p3 }
  0x54   :  { %p2679_p6 = pnand %p2678_p5, %p2672_p2 }
  0x56   :  { %2682 = shalt.err (!%p2679_p6)
}
  0x57   :  { %56 = dma.hbm_to_vmem [thread:$0]  %s3167_s2, 64, %s54_s14, [#allocation6]  }
  0x58   :  { %s2691_s3 = scalar_lea.vmem %s76_s16, 192  ;;  %p2696_p8 = scmp.lt.s32.totalorder %s76_s16, %s76_s16 }
  0x59   :  { %p2692_p7 = scmp.ne.s32.totalorder %s76_s16, %s2691_s3  ;;  %p2697_p9 = scmp.lt.s32.totalorder %s2691_s3, %s2691_s3 }
  0x5b   :  { %p2698_p10 = por %p2697_p9, %p2696_p8 }
  0x5d   :  { %p2699_p11 = pnand %p2698_p10, %p2692_p7 }
  0x5f   :  { %2702 = shalt.err (!%p2699_p11)
}
  0x60   :  { %78 = dma.hbm_to_vmem [thread:$0]  %s3169_s4, 192, %s76_s16, [#allocation9]  }
  0x61   :  { %s2812_s22 = smov [#allocation13]   ;;  %s2813_s24 = smov [#allocation16]  }
  0x62   :  { %s97_s23 = sshll.u32 %s2812_s22, 4  ;;  %s117_s25 = sshll.u32 %s2813_s24, 4  ;;  %s98_s23 = int_to_ptr.vmem [resolvable:$true] %s97_s23  ;;  %s118_s25 = int_to_ptr.vmem [resolvable:$true] %s117_s25 }
  0x63   :  { %s2711_s5 = scalar_lea.vmem %s98_s23, 96  ;;  %p2716_p13 = scmp.lt.s32.totalorder %s98_s23, %s98_s23 }
  0x64   :  { %p2712_p12 = scmp.ne.s32.totalorder %s98_s23, %s2711_s5  ;;  %p2717_p0 = scmp.lt.s32.totalorder %s2711_s5, %s2711_s5 }
  0x66   :  { %p2718_p1 = por %p2717_p0, %p2716_p13 }
  0x68   :  { %p2719_p2 = pnand %p2718_p1, %p2712_p12 }
  0x6a   :  { %2722 = shalt.err (!%p2719_p2)
}
  0x6b   :  { %100 = dma.hbm_to_vmem [thread:$0]  %s3171_s6, 96, %s98_s23, [#allocation12]  }
  0x6c   :  { %s2731_s27 = scalar_lea.vmem %s118_s25, 96  ;;  %p2736_p4 = scmp.lt.s32.totalorder %s118_s25, %s118_s25 }
  0x6d   :  { %p2732_p3 = scmp.ne.s32.totalorder %s118_s25, %s2731_s27  ;;  %p2737_p5 = scmp.lt.s32.totalorder %s2731_s27, %s2731_s27 }
  0x6f   :  { %p2738_p6 = por %p2737_p5, %p2736_p4 }
  0x71   :  { %p2739_p7 = pnand %p2738_p6, %p2732_p3 }
  0x73   :  { %2742 = shalt.err (!%p2739_p7)
}
  0x74   :  { %120 = dma.hbm_to_vmem [thread:$0]  %s3173_s8, 96, %s118_s25, [#allocation15]  }
  0x75   :  { %s2814_s29 = smov [#allocation19]  }
  0x76   :  { %s137_s30 = sshll.u32 %s2814_s29, 4  ;;  %s138_s30 = int_to_ptr.vmem [resolvable:$true] %s137_s30 }
  0x77   :  { %s2751_s12 = scalar_lea.vmem %s138_s30, 16  ;;  %s2755_s13 = scalar_lea.vmem %s138_s30, 32 }
  0x78   :  { %p2752_p8 = scmp.ne.s32.totalorder %s138_s30, %s2751_s12  ;;  %p2756_p9 = scmp.lt.s32.totalorder %s138_s30, %s138_s30 }
  0x79   :  { %p2757_p10 = scmp.lt.s32.totalorder %s2755_s13, %s2751_s12 }
  0x7b   :  { %p2758_p11 = por %p2757_p10, %p2756_p9 }
  0x7d   :  { %p2759_p12 = pnand %p2758_p11, %p2752_p8 }
  0x7f   :  { %2762 = shalt.err (!%p2759_p12)
}
  0x80   :  { %140 = dma.hbm_to_vmem [thread:$0]  %s3175_s10, 16, %s138_s30, [#allocation18]  }
  0x81   :  { %2783 = dma.done.wait [#allocation3], 128  }
  0x82   :  { %2784 = vsyncadd [#allocation3], 4294967168 }
  0x83   :  { %2785 = dma.done.wait [#allocation6], 2112  }
  0x84   :  { %2786 = vsyncadd [#allocation6], 4294965184 }
  0x85   :  { %2787 = dma.done.wait [#allocation9], 49344  }
  0x86   :  { %2788 = vsyncadd [#allocation9], 4294917952 }
  0x87   :  { %2789 = dma.done.wait [#allocation12], 24672  }
  0x88   :  { %2790 = vsyncadd [#allocation12], 4294942624 }
  0x89   :  { %2791 = dma.done.wait [#allocation15], 288  }
  0x8a   :  { %2792 = vsyncadd [#allocation15], 4294967008 }
  0x8b   :  { %2793 = dma.done.wait [#allocation18], 32  }
  0x8c   :  { %2794 = vsyncadd [#allocation18], 4294967264  ;;  %v2815_v0 = vmov 0.0   ;;  %v188_v1 = vld [vmem:[#allocation5 + $0x68] sm:$0xff]  ;;  %v187_v2 = vld [vmem:[#allocation5 + $0x60] sm:$0xff]  ;;  %vm213_vm0 = vcmask 261120  }
  0x8d   :  { %281 = vmatprep.mubr.f32.mxu1 %v2815_v0  ;;  %v184_v3 = vld [vmem:[#allocation5 + $0x48] sm:$0xff]  ;;  %241 = vmatprep.subr.mxu1 %v188_v1  ;;  %v183_v4 = vld [vmem:[#allocation5 + $0x40] sm:$0xff]  ;;  %v174_v10 = vld [vmem:[#allocation2] sm:$0xff]  ;;  %vm1531_vm1 = vcmask 1043456   ;;  %vm2373_vm2 = vcmask 1045504   ;;  %vm1676_vm3 = vcmask 130112  }
  0x8e   :  { %242 = vmatpush1.msra.mxu1 %v187_v2  ;;  %v180_v5 = vld [vmem:[#allocation5 + $0x28] sm:$0xff]  ;;  %v179_v6 = vld [vmem:[#allocation5 + $0x20] sm:$0xff]  ;;  %v190_v11 = vld [vmem:[#allocation5 + $0x78] sm:$0xff]  ;;  %vm1741_vm4 = vcmask 1041409   ;;  %vm1743_vm5 = vcmask 1042434   ;;  %vm1745_vm6 = vcmask 1043459  }
  0x8f   :  { %243 = vmatprep.subr.mxu1 %v184_v3  ;;  %v176_v7 = vld [vmem:[#allocation5 + $0x8] sm:$0xff]  ;;  %v175_v8 = vld [vmem:[#allocation5] sm:$0xff]  ;;  %v189_v13 = vld [vmem:[#allocation5 + $0x70] sm:$0xff]  ;;  %vm1747_vm7 = vcmask 1044484   ;;  %vm1749_vm8 = vcmask 1045509   ;;  %vm1751_vm9 = vcmask 1046534  }
  0x90   :  { %244 = vmatpush1.msra.mxu1 %v183_v4  ;;  %v544_v9 = vld [vmem:[#allocation8 + $0x5a8] sm:$0xff]  ;;  %v543_v12 = vld [vmem:[#allocation8 + $0x5a0] sm:$0xff]  ;;  %v186_v15 = vld [vmem:[#allocation5 + $0x58] sm:$0xff]  ;;  %vm1753_vm10 = vcmask 1047559   ;;  %vm1756_vm11 = vcmask 97280   ;;  %vm2489_vm12 = vcmask 146528  }
  0x91   :  { %245 = vmatprep.subr.mxu1 %v180_v5  ;;  %811 = vmatprep.subr.mxu0 %v544_v9  ;;  %v532_v14 = vld [vmem:[#allocation8 + $0x548] sm:$0xff]  ;;  %v531_v16 = vld [vmem:[#allocation8 + $0x540] sm:$0xff]  ;;  %v182_v19 = vld [vmem:[#allocation5 + $0x38] sm:$0xff] }
  0x92   :  { %246 = vmatpush1.msra.mxu1 %v179_v6  ;;  %812 = vmatpush1.msra.mxu0 %v543_v12  ;;  %v185_v17 = vld [vmem:[#allocation5 + $0x50] sm:$0xff]  ;;  %v519_v20 = vld [vmem:[#allocation8 + $0x4e0] sm:$0xff]  ;;  %v178_v23 = vld [vmem:[#allocation5 + $0x18] sm:$0xff] }
  0x93   :  { %247 = vmatprep.subr.mxu1 %v176_v7  ;;  %813 = vmatprep.subr.mxu0 %v532_v14  ;;  %v520_v18 = vld [vmem:[#allocation8 + $0x4e8] sm:$0xff]  ;;  %v507_v24 = vld [vmem:[#allocation8 + $0x480] sm:$0xff]  ;;  %v546_v27 = vld [vmem:[#allocation8 + $0x5b8] sm:$0xff] }
  0x94   :  { %248 = vmatpush1.msra.mxu1 %v175_v8  ;;  %v181_v21 = vld [vmem:[#allocation5 + $0x30] sm:$0xff]  ;;  %814 = vmatpush1.msra.mxu0 %v531_v16  ;;  %v495_v29 = vld [vmem:[#allocation8 + $0x420] sm:$0xff]  ;;  %v534_v30 = vld [vmem:[#allocation8 + $0x558] sm:$0xff] }
  0x95   :  { %2513 = vmatmul.mubr.msk.f32.vlgmr.msra.gmra.mxu1 %vm213_vm0, %v174_v10  ;;  %312 = vmatprep.subr.mxu1 %v190_v11  ;;  %v508_v22 = vld [vmem:[#allocation8 + $0x488] sm:$0xff]  ;;  %v545_v28 = vld [vmem:[#allocation8 + $0x5b0] sm:$0xff]  ;;  %v483_v33 = vld [vmem:[#allocation8 + $0x3c0] sm:$0xff] }
  0x96   :  { %313 = vmatpush1.msra.mxu1 %v189_v13  ;;  %352 = vmatprep.mubr.f32.mxu1 %v2815_v0  ;;  %v177_v25 = vld [vmem:[#allocation5 + $0x10] sm:$0xff]  ;;  %v522_v34 = vld [vmem:[#allocation8 + $0x4f8] sm:$0xff]  ;;  %v471_v37 = vld [vmem:[#allocation8 + $0x360] sm:$0xff] }
  0x97   :  { %314 = vmatprep.subr.mxu1 %v186_v15  ;;  %815 = vmatprep.subr.mxu0 %v520_v18  ;;  %v496_v26 = vld [vmem:[#allocation8 + $0x428] sm:$0xff]  ;;  %v533_v32 = vld [vmem:[#allocation8 + $0x550] sm:$0xff]  ;;  %v510_v38 = vld [vmem:[#allocation8 + $0x498] sm:$0xff] }
  0x98   :  { %315 = vmatpush1.msra.mxu1 %v185_v17  ;;  %816 = vmatpush1.msra.mxu0 %v519_v20  ;;  %v484_v31 = vld [vmem:[#allocation8 + $0x3c8] sm:$0xff]  ;;  %v521_v36 = vld [vmem:[#allocation8 + $0x4f0] sm:$0xff]  ;;  %v459_v41 = vld [vmem:[#allocation8 + $0x300] sm:$0xff] }
  0x99   :  { %316 = vmatprep.subr.mxu1 %v182_v19  ;;  %817 = vmatprep.subr.mxu0 %v508_v22  ;;  %v472_v35 = vld [vmem:[#allocation8 + $0x368] sm:$0xff]  ;;  %v509_v40 = vld [vmem:[#allocation8 + $0x490] sm:$0xff]  ;;  %v498_v42 = vld [vmem:[#allocation8 + $0x438] sm:$0xff] }
  0x9a   :  { %317 = vmatpush1.msra.mxu1 %v181_v21  ;;  %818 = vmatpush1.msra.mxu0 %v507_v24  ;;  %v460_v39 = vld [vmem:[#allocation8 + $0x308] sm:$0xff]  ;;  %v497_v44 = vld [vmem:[#allocation8 + $0x430] sm:$0xff]  ;;  %v447_v45 = vld [vmem:[#allocation8 + $0x2a0] sm:$0xff] }
  0x9b   :  { %318 = vmatprep.subr.mxu1 %v178_v23  ;;  %819 = vmatprep.subr.mxu0 %v496_v26  ;;  %v448_v43 = vld [vmem:[#allocation8 + $0x2a8] sm:$0xff]  ;;  %v486_v46 = vld [vmem:[#allocation8 + $0x3d8] sm:$0xff]  ;;  %v485_v48 = vld [vmem:[#allocation8 + $0x3d0] sm:$0xff] }
  0x9c   :  { %319 = vmatpush1.msra.mxu1 %v177_v25  ;;  %820 = vmatpush1.msra.mxu0 %v495_v29  ;;  %v436_v47 = vld [vmem:[#allocation8 + $0x248] sm:$0xff]  ;;  %v435_v49 = vld [vmem:[#allocation8 + $0x240] sm:$0xff]  ;;  %v474_v50 = vld [vmem:[#allocation8 + $0x378] sm:$0xff] }
  0x9d   :  { %882 = vmatprep.subr.mxu1 %v546_v27  ;;  %2514 = vmatmul.mubr.msk.f32.vlgmr.msra.gmra.mxu1 %vm213_vm0, %v174_v10  ;;  %v424_v51 = vld [vmem:[#allocation8 + $0x1e8] sm:$0xff]  ;;  %v473_v52 = vld [vmem:[#allocation8 + $0x370] sm:$0xff]  ;;  %v423_v53 = vld [vmem:[#allocation8 + $0x1e0] sm:$0xff] }
  0x9e   :  { %883 = vmatpush1.msra.mxu1 %v545_v28  ;;  %821 = vmatprep.subr.mxu0 %v484_v31  ;;  %v462_v54 = vld [vmem:[#allocation8 + $0x318] sm:$0xff]  ;;  %v412_v55 = vld [vmem:[#allocation8 + $0x188] sm:$0xff]  ;;  %v461_v56 = vld [vmem:[#allocation8 + $0x310] sm:$0xff] }
  0x9f   :  { %884 = vmatprep.subr.mxu1 %v534_v30  ;;  %822 = vmatpush1.msra.mxu0 %v483_v33  ;;  %v411_v57 = vld [vmem:[#allocation8 + $0x180] sm:$0xff]  ;;  %v450_v58 = vld [vmem:[#allocation8 + $0x2b8] sm:$0xff]  ;;  %v400_v59 = vld [vmem:[#allocation8 + $0x128] sm:$0xff] }
  0xa0   :  { %885 = vmatpush1.msra.mxu1 %v533_v32  ;;  %823 = vmatprep.subr.mxu0 %v472_v35  ;;  %v449_v60 = vld [vmem:[#allocation8 + $0x2b0] sm:$0xff]  ;;  %v399_v61 = vld [vmem:[#allocation8 + $0x120] sm:$0xff]  ;;  %v438_v62 = vld [vmem:[#allocation8 + $0x258] sm:$0xff] }
  0xa1   :  { %886 = vmatprep.subr.mxu1 %v522_v34  ;;  %824 = vmatpush1.msra.mxu0 %v471_v37  ;;  %v388_v63 = vld [vmem:[#allocation8 + $0xc8] sm:$0xff]  ;;  %v437_v1 = vld [vmem:[#allocation8 + $0x250] sm:$0xff]  ;;  %v387_v2 = vld [vmem:[#allocation8 + $0xc0] sm:$0xff] }
  0xa2   :  { %887 = vmatpush1.msra.mxu1 %v521_v36  ;;  %825 = vmatprep.subr.mxu0 %v460_v39  ;;  %v426_v3 = vld [vmem:[#allocation8 + $0x1f8] sm:$0xff]  ;;  %v376_v4 = vld [vmem:[#allocation8 + $0x68] sm:$0xff]  ;;  %v425_v5 = vld [vmem:[#allocation8 + $0x1f0] sm:$0xff] }
  0xa3   :  { %888 = vmatprep.subr.mxu1 %v510_v38  ;;  %826 = vmatpush1.msra.mxu0 %v459_v41  ;;  %v375_v6 = vld [vmem:[#allocation8 + $0x60] sm:$0xff]  ;;  %v414_v7 = vld [vmem:[#allocation8 + $0x198] sm:$0xff]  ;;  %v364_v8 = vld [vmem:[#allocation8 + $0x8] sm:$0xff] }
  0xa4   :  { %889 = vmatpush1.msra.mxu1 %v509_v40  ;;  %827 = vmatprep.subr.mxu0 %v448_v43  ;;  %v413_v9 = vld [vmem:[#allocation8 + $0x190] sm:$0xff]  ;;  %v363_v10 = vld [vmem:[#allocation8] sm:$0xff]  ;;  %v402_v11 = vld [vmem:[#allocation8 + $0x138] sm:$0xff] }
  0xa5   :  { %890 = vmatprep.subr.mxu1 %v498_v42  ;;  %828 = vmatpush1.msra.mxu0 %v447_v45  ;;  %v736_v12 = vld [vmem:[#allocation8 + $0xba8] sm:$0xff]  ;;  %v401_v13 = vld [vmem:[#allocation8 + $0x130] sm:$0xff]  ;;  %v735_v14 = vld [vmem:[#allocation8 + $0xba0] sm:$0xff] }
  0xa6   :  { %891 = vmatpush1.msra.mxu1 %v497_v44  ;;  %829 = vmatprep.subr.mxu0 %v436_v47  ;;  %v390_v15 = vld [vmem:[#allocation8 + $0xd8] sm:$0xff]  ;;  %v724_v16 = vld [vmem:[#allocation8 + $0xb48] sm:$0xff]  ;;  %v389_v17 = vld [vmem:[#allocation8 + $0xd0] sm:$0xff] }
  0xa7   :  { %892 = vmatprep.subr.mxu1 %v486_v46  ;;  %830 = vmatpush1.msra.mxu0 %v435_v49  ;;  %v723_v18 = vld [vmem:[#allocation8 + $0xb40] sm:$0xff]  ;;  %v378_v19 = vld [vmem:[#allocation8 + $0x78] sm:$0xff]  ;;  %v712_v20 = vld [vmem:[#allocation8 + $0xae8] sm:$0xff] }
  0xa8   :  { %893 = vmatpush1.msra.mxu1 %v485_v48  ;;  %831 = vmatprep.subr.mxu0 %v424_v51  ;;  %v377_v21 = vld [vmem:[#allocation8 + $0x70] sm:$0xff]  ;;  %v711_v22 = vld [vmem:[#allocation8 + $0xae0] sm:$0xff]  ;;  %v366_v23 = vld [vmem:[#allocation8 + $0x18] sm:$0xff] }
  0xa9   :  { %894 = vmatprep.subr.mxu1 %v474_v50  ;;  %832 = vmatpush1.msra.mxu0 %v423_v53  ;;  %v700_v24 = vld [vmem:[#allocation8 + $0xa88] sm:$0xff]  ;;  %v365_v25 = vld [vmem:[#allocation8 + $0x10] sm:$0xff]  ;;  %v699_v26 = vld [vmem:[#allocation8 + $0xa80] sm:$0xff] }
  0xaa   :  { %895 = vmatpush1.msra.mxu1 %v473_v52  ;;  %833 = vmatprep.subr.mxu0 %v412_v55  ;;  %v738_v27 = vld [vmem:[#allocation8 + $0xbb8] sm:$0xff]  ;;  %v688_v28 = vld [vmem:[#allocation8 + $0xa28] sm:$0xff]  ;;  %v737_v29 = vld [vmem:[#allocation8 + $0xbb0] sm:$0xff] }
  0xab   :  { %896 = vmatprep.subr.mxu1 %v462_v54  ;;  %834 = vmatpush1.msra.mxu0 %v411_v57  ;;  %v687_v30 = vld [vmem:[#allocation8 + $0xa20] sm:$0xff]  ;;  %v726_v31 = vld [vmem:[#allocation8 + $0xb58] sm:$0xff]  ;;  %v676_v32 = vld [vmem:[#allocation8 + $0x9c8] sm:$0xff] }
  0xac   :  { %897 = vmatpush1.msra.mxu1 %v461_v56  ;;  %835 = vmatprep.subr.mxu0 %v400_v59  ;;  %v725_v33 = vld [vmem:[#allocation8 + $0xb50] sm:$0xff]  ;;  %v675_v34 = vld [vmem:[#allocation8 + $0x9c0] sm:$0xff]  ;;  %v714_v35 = vld [vmem:[#allocation8 + $0xaf8] sm:$0xff] }
  0xad   :  { %898 = vmatprep.subr.mxu1 %v450_v58  ;;  %836 = vmatpush1.msra.mxu0 %v399_v61  ;;  %v664_v36 = vld [vmem:[#allocation8 + $0x968] sm:$0xff]  ;;  %v713_v37 = vld [vmem:[#allocation8 + $0xaf0] sm:$0xff]  ;;  %v663_v38 = vld [vmem:[#allocation8 + $0x960] sm:$0xff] }
  0xae   :  { %899 = vmatpush1.msra.mxu1 %v449_v60  ;;  %837 = vmatprep.subr.mxu0 %v388_v63  ;;  %v702_v39 = vld [vmem:[#allocation8 + $0xa98] sm:$0xff]  ;;  %v652_v40 = vld [vmem:[#allocation8 + $0x908] sm:$0xff]  ;;  %v701_v41 = vld [vmem:[#allocation8 + $0xa90] sm:$0xff] }
  0xaf   :  { %900 = vmatprep.subr.mxu1 %v438_v62  ;;  %838 = vmatpush1.msra.mxu0 %v387_v2  ;;  %v651_v42 = vld [vmem:[#allocation8 + $0x900] sm:$0xff]  ;;  %v690_v43 = vld [vmem:[#allocation8 + $0xa38] sm:$0xff]  ;;  %v640_v44 = vld [vmem:[#allocation8 + $0x8a8] sm:$0xff] }
  0xb0   :  { %901 = vmatpush1.msra.mxu1 %v437_v1  ;;  %839 = vmatprep.subr.mxu0 %v376_v4  ;;  %v689_v45 = vld [vmem:[#allocation8 + $0xa30] sm:$0xff]  ;;  %v639_v46 = vld [vmem:[#allocation8 + $0x8a0] sm:$0xff]  ;;  %v678_v47 = vld [vmem:[#allocation8 + $0x9d8] sm:$0xff] }
  0xb1   :  { %902 = vmatprep.subr.mxu1 %v426_v3  ;;  %840 = vmatpush1.msra.mxu0 %v375_v6  ;;  %v628_v48 = vld [vmem:[#allocation8 + $0x848] sm:$0xff]  ;;  %v677_v49 = vld [vmem:[#allocation8 + $0x9d0] sm:$0xff]  ;;  %v627_v50 = vld [vmem:[#allocation8 + $0x840] sm:$0xff] }
  0xb2   :  { %903 = vmatpush1.msra.mxu1 %v425_v5  ;;  %841 = vmatprep.subr.mxu0 %v364_v8  ;;  %v666_v51 = vld [vmem:[#allocation8 + $0x978] sm:$0xff]  ;;  %v616_v52 = vld [vmem:[#allocation8 + $0x7e8] sm:$0xff]  ;;  %v665_v53 = vld [vmem:[#allocation8 + $0x970] sm:$0xff] }
  0xb3   :  { %904 = vmatprep.subr.mxu1 %v414_v7  ;;  %842 = vmatpush1.msra.mxu0 %v363_v10  ;;  %v615_v54 = vld [vmem:[#allocation8 + $0x7e0] sm:$0xff]  ;;  %v654_v55 = vld [vmem:[#allocation8 + $0x918] sm:$0xff]  ;;  %v604_v56 = vld [vmem:[#allocation8 + $0x788] sm:$0xff] }
  0xb4   :  { %905 = vmatpush1.msra.mxu1 %v413_v9  ;;  %843 = vmatprep.subr.mxu0 %v736_v12  ;;  %v653_v57 = vld [vmem:[#allocation8 + $0x910] sm:$0xff]  ;;  %v603_v58 = vld [vmem:[#allocation8 + $0x780] sm:$0xff]  ;;  %v642_v59 = vld [vmem:[#allocation8 + $0x8b8] sm:$0xff] }
  0xb5   :  { %906 = vmatprep.subr.mxu1 %v402_v11  ;;  %844 = vmatpush2.msra.mxu0 %v735_v14  ;;  %v592_v60 = vld [vmem:[#allocation8 + $0x728] sm:$0xff]  ;;  %v641_v61 = vld [vmem:[#allocation8 + $0x8b0] sm:$0xff]  ;;  %v630_v62 = vld [vmem:[#allocation8 + $0x858] sm:$0xff] }
  0xb6   :  { %907 = vmatpush1.msra.mxu1 %v401_v13  ;;  %845 = vmatprep.subr.mxu0 %v724_v16  ;;  %v629_v63 = vld [vmem:[#allocation8 + $0x850] sm:$0xff]  ;;  %v618_v1 = vld [vmem:[#allocation8 + $0x7f8] sm:$0xff]  ;;  %v591_v6 = vld [vmem:[#allocation8 + $0x720] sm:$0xff] }
  0xb7   :  { %908 = vmatprep.subr.mxu1 %v390_v15  ;;  %846 = vmatpush2.msra.mxu0 %v723_v18  ;;  %v617_v2 = vld [vmem:[#allocation8 + $0x7f0] sm:$0xff]  ;;  %v606_v3 = vld [vmem:[#allocation8 + $0x798] sm:$0xff]  ;;  %v580_v8 = vld [vmem:[#allocation8 + $0x6c8] sm:$0xff] }
  0xb8   :  { %909 = vmatpush1.msra.mxu1 %v389_v17  ;;  %847 = vmatprep.subr.mxu0 %v712_v20  ;;  %v605_v4 = vld [vmem:[#allocation8 + $0x790] sm:$0xff]  ;;  %v594_v5 = vld [vmem:[#allocation8 + $0x738] sm:$0xff]  ;;  %v579_v10 = vld [vmem:[#allocation8 + $0x6c0] sm:$0xff] }
  0xb9   :  { %910 = vmatprep.subr.mxu1 %v378_v19  ;;  %848 = vmatpush2.msra.mxu0 %v711_v22  ;;  %v593_v7 = vld [vmem:[#allocation8 + $0x730] sm:$0xff]  ;;  %v582_v9 = vld [vmem:[#allocation8 + $0x6d8] sm:$0xff]  ;;  %v568_v12 = vld [vmem:[#allocation8 + $0x668] sm:$0xff]  ;;  %v193_v22 = vlaneseq }
  0xba   :  { %911 = vmatpush1.msra.mxu1 %v377_v21  ;;  %849 = vmatprep.subr.mxu0 %v700_v24  ;;  %v581_v11 = vld [vmem:[#allocation8 + $0x6d0] sm:$0xff]  ;;  %v570_v13 = vld [vmem:[#allocation8 + $0x678] sm:$0xff]  ;;  %v567_v14 = vld [vmem:[#allocation8 + $0x660] sm:$0xff] }
  0xbb   :  { %912 = vmatprep.subr.mxu1 %v366_v23  ;;  %850 = vmatpush2.msra.mxu0 %v699_v26  ;;  %v569_v15 = vld [vmem:[#allocation8 + $0x670] sm:$0xff]  ;;  %v556_v16 = vld [vmem:[#allocation8 + $0x608] sm:$0xff]  ;;  %v558_v17 = vld [vmem:[#allocation8 + $0x618] sm:$0xff]  ;;  %v2922_v23 = vshrl.u32 %v193_v22, 7 }
  0xbc   :  { %913 = vmatpush1.msra.mxu1 %v365_v25  ;;  %851 = vmatprep.subr.mxu0 %v688_v28  ;;  %v555_v18 = vld [vmem:[#allocation8 + $0x600] sm:$0xff]  ;;  %v557_v19 = vld [vmem:[#allocation8 + $0x610] sm:$0xff]  ;;  %v548_v20 = vld [vmem:[#allocation8 + $0x5c8] sm:$0xff] }
  0xbd   :  { %914 = vmatprep.subr.mxu1 %v738_v27  ;;  %852 = vmatpush2.msra.mxu0 %v687_v30  ;;  %v550_v21 = vld [vmem:[#allocation8 + $0x5d8] sm:$0xff]  ;;  %v2925_v24 = vsub.s32 0, %v2922_v23  ;;  %v2928_v26 = vsub.s32 1, %v2922_v23 }
  0xbe   :  { %915 = vmatpush2.msra.mxu1 %v737_v29  ;;  %853 = vmatprep.subr.mxu0 %v676_v32  ;;  %v191_v25 = vld [vmem:[#allocation7] sm:$0xf] }
  0xbf   :  { %916 = vmatprep.subr.mxu1 %v726_v31  ;;  %854 = vmatpush2.msra.mxu0 %v675_v34  ;;  %v196_v27 = vrot.slane %v191_v25, %v2925_v24  ;;  %v200_v28 = vrot.slane %v191_v25, %v2928_v26  ;;  %v392_v25 = vld [vmem:[#allocation8 + $0xe8] sm:$0xff] }
  0xc0   :  { %917 = vmatpush2.msra.mxu1 %v725_v33  ;;  %855 = vmatprep.subr.mxu0 %v664_v36  ;;  %v549_v36 = vld [vmem:[#allocation8 + $0x5d0] sm:$0xff] }
  0xc1   :  { %918 = vmatprep.subr.mxu1 %v714_v35  ;;  %856 = vmatpush2.msra.mxu0 %v663_v38  ;;  %v547_v35 = vld [vmem:[#allocation8 + $0x5c0] sm:$0xff]  ;;  %v538_v38 = vld [vmem:[#allocation8 + $0x578] sm:$0xff] }
  0xc2   :  { %919 = vmatpush2.msra.mxu1 %v713_v37  ;;  %857 = vmatprep.subr.mxu0 %v652_v40  ;;  %v536_v37 = vld [vmem:[#allocation8 + $0x568] sm:$0xff]  ;;  %v537_v40 = vld [vmem:[#allocation8 + $0x570] sm:$0xff] }
  0xc3   :  { %920 = vmatprep.subr.mxu1 %v702_v39  ;;  %858 = vmatpush2.msra.mxu0 %v651_v42  ;;  %v535_v39 = vld [vmem:[#allocation8 + $0x560] sm:$0xff]  ;;  %v526_v42 = vld [vmem:[#allocation8 + $0x518] sm:$0xff] }
  0xc4   :  { %921 = vmatpush2.msra.mxu1 %v701_v41  ;;  %859 = vmatprep.subr.mxu0 %v640_v44  ;;  %v524_v41 = vld [vmem:[#allocation8 + $0x508] sm:$0xff]  ;;  %v525_v44 = vld [vmem:[#allocation8 + $0x510] sm:$0xff] }
  0xc5   :  { %922 = vmatprep.subr.mxu1 %v690_v43  ;;  %860 = vmatpush2.msra.mxu0 %v639_v46  ;;  %v523_v43 = vld [vmem:[#allocation8 + $0x500] sm:$0xff]  ;;  %v514_v46 = vld [vmem:[#allocation8 + $0x4b8] sm:$0xff] }
  0xc6   :  { %923 = vmatpush2.msra.mxu1 %v689_v45  ;;  %861 = vmatprep.subr.mxu0 %v628_v48  ;;  %v512_v45 = vld [vmem:[#allocation8 + $0x4a8] sm:$0xff]  ;;  %v513_v48 = vld [vmem:[#allocation8 + $0x4b0] sm:$0xff] }
  0xc7   :  { %924 = vmatprep.subr.mxu1 %v678_v47  ;;  %862 = vmatpush2.msra.mxu0 %v627_v50  ;;  %v511_v47 = vld [vmem:[#allocation8 + $0x4a0] sm:$0xff]  ;;  %v502_v50 = vld [vmem:[#allocation8 + $0x458] sm:$0xff] }
  0xc8   :  { %925 = vmatpush2.msra.mxu1 %v677_v49  ;;  %863 = vmatprep.subr.mxu0 %v616_v52  ;;  %v500_v49 = vld [vmem:[#allocation8 + $0x448] sm:$0xff]  ;;  %v501_v52 = vld [vmem:[#allocation8 + $0x450] sm:$0xff] }
  0xc9   :  { %926 = vmatprep.subr.mxu1 %v666_v51  ;;  %864 = vmatpush2.msra.mxu0 %v615_v54  ;;  %v499_v51 = vld [vmem:[#allocation8 + $0x440] sm:$0xff]  ;;  %v490_v54 = vld [vmem:[#allocation8 + $0x3f8] sm:$0xff] }
  0xca   :  { %927 = vmatpush2.msra.mxu1 %v665_v53  ;;  %865 = vmatprep.subr.mxu0 %v604_v56  ;;  %v488_v53 = vld [vmem:[#allocation8 + $0x3e8] sm:$0xff]  ;;  %v489_v56 = vld [vmem:[#allocation8 + $0x3f0] sm:$0xff] }
  0xcb   :  { %928 = vmatprep.subr.mxu1 %v654_v55  ;;  %866 = vmatpush2.msra.mxu0 %v603_v58  ;;  %v487_v55 = vld [vmem:[#allocation8 + $0x3e0] sm:$0xff]  ;;  %v478_v58 = vld [vmem:[#allocation8 + $0x398] sm:$0xff] }
  0xcc   :  { %929 = vmatpush2.msra.mxu1 %v653_v57  ;;  %867 = vmatprep.subr.mxu0 %v592_v60  ;;  %v476_v57 = vld [vmem:[#allocation8 + $0x388] sm:$0xff]  ;;  %v477_v60 = vld [vmem:[#allocation8 + $0x390] sm:$0xff] }
  0xcd   :  { %930 = vmatprep.subr.mxu1 %v642_v59  ;;  %868 = vmatpush2.msra.mxu0 %v591_v6  ;;  %v475_v59 = vld [vmem:[#allocation8 + $0x380] sm:$0xff]  ;;  %v440_v6 = vld [vmem:[#allocation8 + $0x268] sm:$0xff] }
  0xce   :  { %931 = vmatpush2.msra.mxu1 %v641_v61  ;;  %869 = vmatprep.subr.mxu0 %v580_v8  ;;  %v464_v61 = vld [vmem:[#allocation8 + $0x328] sm:$0xff]  ;;  %v439_v8 = vld [vmem:[#allocation8 + $0x260] sm:$0xff] }
  0xcf   :  { %932 = vmatprep.subr.mxu1 %v630_v62  ;;  %870 = vmatpush2.msra.mxu0 %v579_v10  ;;  %v466_v62 = vld [vmem:[#allocation8 + $0x338] sm:$0xff]  ;;  %v428_v10 = vld [vmem:[#allocation8 + $0x208] sm:$0xff] }
  0xd0   :  { %933 = vmatpush2.msra.mxu1 %v629_v63  ;;  %871 = vmatprep.subr.mxu0 %v568_v12  ;;  %v463_v63 = vld [vmem:[#allocation8 + $0x320] sm:$0xff] }
  0xd1   :  { %934 = vmatprep.subr.mxu1 %v618_v1  ;;  %872 = vmatpush2.msra.mxu0 %v567_v14  ;;  %v465_v1 = vld [vmem:[#allocation8 + $0x330] sm:$0xff]  ;;  %v427_v12 = vld [vmem:[#allocation8 + $0x200] sm:$0xff]  ;;  %v416_v14 = vld [vmem:[#allocation8 + $0x1a8] sm:$0xff] }
  0xd2   :  { %935 = vmatpush2.msra.mxu1 %v617_v2  ;;  %873 = vmatprep.subr.mxu0 %v556_v16  ;;  %v452_v2 = vld [vmem:[#allocation8 + $0x2c8] sm:$0xff]  ;;  %v415_v16 = vld [vmem:[#allocation8 + $0x1a0] sm:$0xff] }
  0xd3   :  { %936 = vmatprep.subr.mxu1 %v606_v3  ;;  %874 = vmatpush2.msra.mxu0 %v555_v18  ;;  %v454_v3 = vld [vmem:[#allocation8 + $0x2d8] sm:$0xff]  ;;  %v404_v18 = vld [vmem:[#allocation8 + $0x148] sm:$0xff] }
  0xd4   :  { %937 = vmatpush2.msra.mxu1 %v605_v4  ;;  %953 = vmatprep.subr.mxu0 %v548_v20  ;;  %v451_v4 = vld [vmem:[#allocation8 + $0x2c0] sm:$0xff] }
  0xd5   :  { %938 = vmatprep.subr.mxu1 %v594_v5  ;;  %v453_v5 = vld [vmem:[#allocation8 + $0x2d0] sm:$0xff]  ;;  %v403_v20 = vld [vmem:[#allocation8 + $0x140] sm:$0xff] }
  0xd6   :  { %939 = vmatpush2.msra.mxu1 %v593_v7  ;;  %v442_v7 = vld [vmem:[#allocation8 + $0x278] sm:$0xff] }
  0xd7   :  { %940 = vmatprep.subr.mxu1 %v582_v9  ;;  %v441_v9 = vld [vmem:[#allocation8 + $0x270] sm:$0xff] }
  0xd8   :  { %941 = vmatpush2.msra.mxu1 %v581_v11  ;;  %v430_v11 = vld [vmem:[#allocation8 + $0x218] sm:$0xff] }
  0xd9   :  { %942 = vmatprep.subr.mxu1 %v570_v13  ;;  %v429_v13 = vld [vmem:[#allocation8 + $0x210] sm:$0xff] }
  0xda   :  { %943 = vmatpush2.msra.mxu1 %v569_v15  ;;  %v418_v15 = vld [vmem:[#allocation8 + $0x1b8] sm:$0xff] }
  0xdb   :  { %944 = vmatprep.subr.mxu1 %v558_v17  ;;  %v417_v17 = vld [vmem:[#allocation8 + $0x1b0] sm:$0xff] }
  0xdc   :  { %945 = vmatpush2.msra.mxu1 %v557_v19  ;;  %v406_v19 = vld [vmem:[#allocation8 + $0x158] sm:$0xff] }
  0xdd   :  { %1024 = vmatprep.subr.mxu1 %v550_v21  ;;  %v405_v21 = vld [vmem:[#allocation8 + $0x150] sm:$0xff] }
 0x155   :  { %v283_v29 = vpop.f32.mrf.mxu1 }
 0x156   :  { %v284_v30 = vadd.f32 %v283_v29, %v196_v27  ;;  %v394_v27 = vld [vmem:[#allocation8 + $0xf8] sm:$0xff]  ;;  %v393_v29 = vld [vmem:[#allocation8 + $0xf0] sm:$0xff] }
 0x157   :  { %v285_v31 = vpop.f32.mrf.mxu1 }
 0x158   :  { %v286_v32 = vadd.f32 %v285_v31, %v200_v28  ;;  %v2934_v34 = vmax.f32 %v284_v30, 0.0  ;;  %v391_v28 = vld [vmem:[#allocation8 + $0xe0] sm:$0xff]  ;;  %v380_v30 = vld [vmem:[#allocation8 + $0x88] sm:$0xff]  ;;  %v382_v31 = vld [vmem:[#allocation8 + $0x98] sm:$0xff] }
 0x15a   :  { %v2932_v33 = vmax.f32 %v286_v32, 0.0  ;;  %v379_v32 = vld [vmem:[#allocation8 + $0x80] sm:$0xff] }
 0x15c   :  { %875 = vmatprep.mubr.f32.mxu0 %v2932_v33  ;;  %946 = vmatprep.mubr.f32.mxu1 %v2932_v33 }
 0x15d   :  { %876 = vmatmul.mubr.f32.vlgmr.msra.gmra.mxu0 %v2934_v34  ;;  %947 = vmatmul.mubr.f32.vlgmr.msra.gmra.mxu1 %v2934_v34 }
 0x15e   :  { %954 = vmatpush1.msra.mxu0 %v547_v35  ;;  %1025 = vmatpush1.msra.mxu1 %v549_v36  ;;  %v381_v35 = vld [vmem:[#allocation8 + $0x90] sm:$0xff]  ;;  %v368_v36 = vld [vmem:[#allocation8 + $0x28] sm:$0xff] }
 0x15f   :  { %955 = vmatprep.subr.mxu0 %v536_v37  ;;  %1017 = vmatprep.mubr.f32.mxu0 %v2932_v33  ;;  %v370_v37 = vld [vmem:[#allocation8 + $0x38] sm:$0xff] }
 0x160   :  { %1026 = vmatprep.subr.mxu1 %v538_v38  ;;  %1088 = vmatprep.mubr.f32.mxu1 %v2932_v33  ;;  %v367_v38 = vld [vmem:[#allocation8 + $0x20] sm:$0xff] }
 0x161   :  { %956 = vmatpush1.msra.mxu0 %v535_v39  ;;  %1027 = vmatpush1.msra.mxu1 %v537_v40  ;;  %v369_v39 = vld [vmem:[#allocation8 + $0x30] sm:$0xff]  ;;  %v740_v40 = vld [vmem:[#allocation8 + $0xbc8] sm:$0xff] }
 0x162   :  { %957 = vmatprep.subr.mxu0 %v524_v41  ;;  %1028 = vmatprep.subr.mxu1 %v526_v42  ;;  %v742_v41 = vld [vmem:[#allocation8 + $0xbd8] sm:$0xff]  ;;  %v739_v42 = vld [vmem:[#allocation8 + $0xbc0] sm:$0xff] }
 0x163   :  { %958 = vmatpush1.msra.mxu0 %v523_v43  ;;  %1029 = vmatpush1.msra.mxu1 %v525_v44  ;;  %v741_v43 = vld [vmem:[#allocation8 + $0xbd0] sm:$0xff]  ;;  %v728_v44 = vld [vmem:[#allocation8 + $0xb68] sm:$0xff] }
 0x164   :  { %959 = vmatprep.subr.mxu0 %v512_v45  ;;  %1030 = vmatprep.subr.mxu1 %v514_v46  ;;  %v730_v45 = vld [vmem:[#allocation8 + $0xb78] sm:$0xff]  ;;  %v727_v46 = vld [vmem:[#allocation8 + $0xb60] sm:$0xff] }
 0x165   :  { %960 = vmatpush1.msra.mxu0 %v511_v47  ;;  %1031 = vmatpush1.msra.mxu1 %v513_v48  ;;  %v729_v47 = vld [vmem:[#allocation8 + $0xb70] sm:$0xff]  ;;  %v716_v48 = vld [vmem:[#allocation8 + $0xb08] sm:$0xff] }
 0x166   :  { %961 = vmatprep.subr.mxu0 %v500_v49  ;;  %1032 = vmatprep.subr.mxu1 %v502_v50  ;;  %v718_v49 = vld [vmem:[#allocation8 + $0xb18] sm:$0xff]  ;;  %v715_v50 = vld [vmem:[#allocation8 + $0xb00] sm:$0xff] }
 0x167   :  { %962 = vmatpush1.msra.mxu0 %v499_v51  ;;  %1033 = vmatpush1.msra.mxu1 %v501_v52  ;;  %v717_v51 = vld [vmem:[#allocation8 + $0xb10] sm:$0xff]  ;;  %v704_v52 = vld [vmem:[#allocation8 + $0xaa8] sm:$0xff] }
 0x168   :  { %963 = vmatprep.subr.mxu0 %v488_v53  ;;  %1034 = vmatprep.subr.mxu1 %v490_v54  ;;  %v706_v53 = vld [vmem:[#allocation8 + $0xab8] sm:$0xff]  ;;  %v703_v54 = vld [vmem:[#allocation8 + $0xaa0] sm:$0xff] }
 0x169   :  { %964 = vmatpush1.msra.mxu0 %v487_v55  ;;  %1035 = vmatpush1.msra.mxu1 %v489_v56  ;;  %v705_v55 = vld [vmem:[#allocation8 + $0xab0] sm:$0xff]  ;;  %v692_v56 = vld [vmem:[#allocation8 + $0xa48] sm:$0xff] }
 0x16a   :  { %965 = vmatprep.subr.mxu0 %v476_v57  ;;  %1036 = vmatprep.subr.mxu1 %v478_v58  ;;  %v694_v57 = vld [vmem:[#allocation8 + $0xa58] sm:$0xff]  ;;  %v691_v58 = vld [vmem:[#allocation8 + $0xa40] sm:$0xff] }
 0x16b   :  { %966 = vmatpush1.msra.mxu0 %v475_v59  ;;  %1037 = vmatpush1.msra.mxu1 %v477_v60  ;;  %v693_v59 = vld [vmem:[#allocation8 + $0xa50] sm:$0xff]  ;;  %v680_v60 = vld [vmem:[#allocation8 + $0x9e8] sm:$0xff] }
 0x16c   :  { %967 = vmatprep.subr.mxu0 %v464_v61  ;;  %1038 = vmatprep.subr.mxu1 %v466_v62  ;;  %v682_v61 = vld [vmem:[#allocation8 + $0x9f8] sm:$0xff]  ;;  %v679_v62 = vld [vmem:[#allocation8 + $0x9e0] sm:$0xff] }
 0x16d   :  { %968 = vmatpush1.msra.mxu0 %v463_v63  ;;  %1039 = vmatpush1.msra.mxu1 %v465_v1  ;;  %v681_v63 = vld [vmem:[#allocation8 + $0x9f0] sm:$0xff]  ;;  %v668_v1 = vld [vmem:[#allocation8 + $0x988] sm:$0xff] }
 0x16e   :  { %969 = vmatprep.subr.mxu0 %v452_v2  ;;  %1040 = vmatprep.subr.mxu1 %v454_v3  ;;  %v670_v2 = vld [vmem:[#allocation8 + $0x998] sm:$0xff]  ;;  %v667_v3 = vld [vmem:[#allocation8 + $0x980] sm:$0xff] }
 0x16f   :  { %970 = vmatpush1.msra.mxu0 %v451_v4  ;;  %1041 = vmatpush1.msra.mxu1 %v453_v5  ;;  %v669_v4 = vld [vmem:[#allocation8 + $0x990] sm:$0xff]  ;;  %v656_v5 = vld [vmem:[#allocation8 + $0x928] sm:$0xff] }
 0x170   :  { %971 = vmatprep.subr.mxu0 %v440_v6  ;;  %1042 = vmatprep.subr.mxu1 %v442_v7  ;;  %v658_v6 = vld [vmem:[#allocation8 + $0x938] sm:$0xff]  ;;  %v655_v7 = vld [vmem:[#allocation8 + $0x920] sm:$0xff] }
 0x171   :  { %972 = vmatpush1.msra.mxu0 %v439_v8  ;;  %1043 = vmatpush1.msra.mxu1 %v441_v9  ;;  %v657_v8 = vld [vmem:[#allocation8 + $0x930] sm:$0xff]  ;;  %v644_v9 = vld [vmem:[#allocation8 + $0x8c8] sm:$0xff] }
 0x172   :  { %973 = vmatprep.subr.mxu0 %v428_v10  ;;  %1044 = vmatprep.subr.mxu1 %v430_v11  ;;  %v646_v10 = vld [vmem:[#allocation8 + $0x8d8] sm:$0xff]  ;;  %v643_v11 = vld [vmem:[#allocation8 + $0x8c0] sm:$0xff] }
 0x173   :  { %974 = vmatpush1.msra.mxu0 %v427_v12  ;;  %1045 = vmatpush1.msra.mxu1 %v429_v13  ;;  %v645_v12 = vld [vmem:[#allocation8 + $0x8d0] sm:$0xff]  ;;  %v632_v13 = vld [vmem:[#allocation8 + $0x868] sm:$0xff] }
 0x174   :  { %975 = vmatprep.subr.mxu0 %v416_v14  ;;  %1046 = vmatprep.subr.mxu1 %v418_v15  ;;  %v634_v14 = vld [vmem:[#allocation8 + $0x878] sm:$0xff]  ;;  %v631_v15 = vld [vmem:[#allocation8 + $0x860] sm:$0xff] }
 0x175   :  { %976 = vmatpush1.msra.mxu0 %v415_v16  ;;  %1047 = vmatpush1.msra.mxu1 %v417_v17  ;;  %v633_v16 = vld [vmem:[#allocation8 + $0x870] sm:$0xff]  ;;  %v620_v17 = vld [vmem:[#allocation8 + $0x808] sm:$0xff] }
 0x176   :  { %977 = vmatprep.subr.mxu0 %v404_v18  ;;  %1048 = vmatprep.subr.mxu1 %v406_v19  ;;  %v622_v18 = vld [vmem:[#allocation8 + $0x818] sm:$0xff]  ;;  %v619_v19 = vld [vmem:[#allocation8 + $0x800] sm:$0xff] }
 0x177   :  { %978 = vmatpush1.msra.mxu0 %v403_v20  ;;  %1049 = vmatpush1.msra.mxu1 %v405_v21  ;;  %v621_v20 = vld [vmem:[#allocation8 + $0x810] sm:$0xff]  ;;  %v608_v21 = vld [vmem:[#allocation8 + $0x7a8] sm:$0xff] }
 0x178   :  { %979 = vmatprep.subr.mxu0 %v392_v25  ;;  %1050 = vmatprep.subr.mxu1 %v394_v27  ;;  %v610_v25 = vld [vmem:[#allocation8 + $0x7b8] sm:$0xff]  ;;  %v607_v27 = vld [vmem:[#allocation8 + $0x7a0] sm:$0xff] }
 0x179   :  { %980 = vmatpush1.msra.mxu0 %v391_v28  ;;  %1051 = vmatpush1.msra.mxu1 %v393_v29  ;;  %v609_v28 = vld [vmem:[#allocation8 + $0x7b0] sm:$0xff]  ;;  %v596_v29 = vld [vmem:[#allocation8 + $0x748] sm:$0xff] }
 0x17a   :  { %981 = vmatprep.subr.mxu0 %v380_v30  ;;  %1052 = vmatprep.subr.mxu1 %v382_v31  ;;  %v598_v30 = vld [vmem:[#allocation8 + $0x758] sm:$0xff]  ;;  %v595_v31 = vld [vmem:[#allocation8 + $0x740] sm:$0xff] }
 0x17b   :  { %982 = vmatpush1.msra.mxu0 %v379_v32  ;;  %1053 = vmatpush1.msra.mxu1 %v381_v35  ;;  %v597_v32 = vld [vmem:[#allocation8 + $0x750] sm:$0xff]  ;;  %v584_v35 = vld [vmem:[#allocation8 + $0x6e8] sm:$0xff] }
 0x17c   :  { %983 = vmatprep.subr.mxu0 %v368_v36  ;;  %1054 = vmatprep.subr.mxu1 %v370_v37  ;;  %v586_v36 = vld [vmem:[#allocation8 + $0x6f8] sm:$0xff]  ;;  %v583_v37 = vld [vmem:[#allocation8 + $0x6e0] sm:$0xff] }
 0x17d   :  { %984 = vmatpush1.msra.mxu0 %v367_v38  ;;  %1055 = vmatpush1.msra.mxu1 %v369_v39  ;;  %v585_v38 = vld [vmem:[#allocation8 + $0x6f0] sm:$0xff]  ;;  %v572_v39 = vld [vmem:[#allocation8 + $0x688] sm:$0xff] }
 0x17e   :  { %985 = vmatprep.subr.mxu0 %v740_v40  ;;  %1056 = vmatprep.subr.mxu1 %v742_v41  ;;  %v574_v40 = vld [vmem:[#allocation8 + $0x698] sm:$0xff]  ;;  %v571_v41 = vld [vmem:[#allocation8 + $0x680] sm:$0xff] }
 0x17f   :  { %986 = vmatpush2.msra.mxu0 %v739_v42  ;;  %1057 = vmatpush2.msra.mxu1 %v741_v43  ;;  %v573_v42 = vld [vmem:[#allocation8 + $0x690] sm:$0xff]  ;;  %v560_v43 = vld [vmem:[#allocation8 + $0x628] sm:$0xff] }
 0x180   :  { %987 = vmatprep.subr.mxu0 %v728_v44  ;;  %1058 = vmatprep.subr.mxu1 %v730_v45  ;;  %v562_v44 = vld [vmem:[#allocation8 + $0x638] sm:$0xff]  ;;  %v559_v45 = vld [vmem:[#allocation8 + $0x620] sm:$0xff] }
 0x181   :  { %988 = vmatpush2.msra.mxu0 %v727_v46  ;;  %1059 = vmatpush2.msra.mxu1 %v729_v47  ;;  %v561_v46 = vld [vmem:[#allocation8 + $0x630] sm:$0xff]  ;;  %v552_v47 = vld [vmem:[#allocation8 + $0x5e8] sm:$0xff] }
 0x182   :  { %989 = vmatprep.subr.mxu0 %v716_v48  ;;  %1060 = vmatprep.subr.mxu1 %v718_v49  ;;  %v554_v48 = vld [vmem:[#allocation8 + $0x5f8] sm:$0xff]  ;;  %v551_v49 = vld [vmem:[#allocation8 + $0x5e0] sm:$0xff] }
 0x183   :  { %990 = vmatpush2.msra.mxu0 %v715_v50  ;;  %1061 = vmatpush2.msra.mxu1 %v717_v51  ;;  %v553_v50 = vld [vmem:[#allocation8 + $0x5f0] sm:$0xff]  ;;  %v540_v51 = vld [vmem:[#allocation8 + $0x588] sm:$0xff] }
 0x184   :  { %991 = vmatprep.subr.mxu0 %v704_v52  ;;  %1062 = vmatprep.subr.mxu1 %v706_v53  ;;  %v542_v52 = vld [vmem:[#allocation8 + $0x598] sm:$0xff]  ;;  %v539_v53 = vld [vmem:[#allocation8 + $0x580] sm:$0xff] }
 0x185   :  { %992 = vmatpush2.msra.mxu0 %v703_v54  ;;  %1063 = vmatpush2.msra.mxu1 %v705_v55  ;;  %v541_v54 = vld [vmem:[#allocation8 + $0x590] sm:$0xff]  ;;  %v528_v55 = vld [vmem:[#allocation8 + $0x528] sm:$0xff] }
 0x186   :  { %993 = vmatprep.subr.mxu0 %v692_v56  ;;  %1064 = vmatprep.subr.mxu1 %v694_v57  ;;  %v530_v56 = vld [vmem:[#allocation8 + $0x538] sm:$0xff]  ;;  %v527_v57 = vld [vmem:[#allocation8 + $0x520] sm:$0xff] }
 0x187   :  { %994 = vmatpush2.msra.mxu0 %v691_v58  ;;  %1065 = vmatpush2.msra.mxu1 %v693_v59  ;;  %v529_v58 = vld [vmem:[#allocation8 + $0x530] sm:$0xff]  ;;  %v516_v59 = vld [vmem:[#allocation8 + $0x4c8] sm:$0xff] }
 0x188   :  { %995 = vmatprep.subr.mxu0 %v680_v60  ;;  %1066 = vmatprep.subr.mxu1 %v682_v61  ;;  %v518_v60 = vld [vmem:[#allocation8 + $0x4d8] sm:$0xff]  ;;  %v515_v61 = vld [vmem:[#allocation8 + $0x4c0] sm:$0xff] }
 0x189   :  { %996 = vmatpush2.msra.mxu0 %v679_v62  ;;  %1067 = vmatpush2.msra.mxu1 %v681_v63  ;;  %v517_v62 = vld [vmem:[#allocation8 + $0x4d0] sm:$0xff]  ;;  %v504_v63 = vld [vmem:[#allocation8 + $0x468] sm:$0xff] }
 0x18a   :  { %997 = vmatprep.subr.mxu0 %v668_v1  ;;  %1068 = vmatprep.subr.mxu1 %v670_v2  ;;  %v506_v1 = vld [vmem:[#allocation8 + $0x478] sm:$0xff]  ;;  %v505_v2 = vld [vmem:[#allocation8 + $0x470] sm:$0xff] }
 0x18b   :  { %998 = vmatpush2.msra.mxu0 %v667_v3  ;;  %1069 = vmatpush2.msra.mxu1 %v669_v4  ;;  %v492_v3 = vld [vmem:[#allocation8 + $0x408] sm:$0xff]  ;;  %v494_v4 = vld [vmem:[#allocation8 + $0x418] sm:$0xff] }
 0x18c   :  { %999 = vmatprep.subr.mxu0 %v656_v5  ;;  %1070 = vmatprep.subr.mxu1 %v658_v6  ;;  %v491_v5 = vld [vmem:[#allocation8 + $0x400] sm:$0xff]  ;;  %v493_v6 = vld [vmem:[#allocation8 + $0x410] sm:$0xff] }
 0x18d   :  { %1000 = vmatpush2.msra.mxu0 %v655_v7  ;;  %1071 = vmatpush2.msra.mxu1 %v657_v8  ;;  %v480_v7 = vld [vmem:[#allocation8 + $0x3a8] sm:$0xff]  ;;  %v482_v8 = vld [vmem:[#allocation8 + $0x3b8] sm:$0xff] }
 0x18e   :  { %1001 = vmatprep.subr.mxu0 %v644_v9  ;;  %1072 = vmatprep.subr.mxu1 %v646_v10  ;;  %v479_v9 = vld [vmem:[#allocation8 + $0x3a0] sm:$0xff]  ;;  %v481_v10 = vld [vmem:[#allocation8 + $0x3b0] sm:$0xff] }
 0x18f   :  { %1002 = vmatpush2.msra.mxu0 %v643_v11  ;;  %1073 = vmatpush2.msra.mxu1 %v645_v12  ;;  %v468_v11 = vld [vmem:[#allocation8 + $0x348] sm:$0xff]  ;;  %v470_v12 = vld [vmem:[#allocation8 + $0x358] sm:$0xff] }
 0x190   :  { %1003 = vmatprep.subr.mxu0 %v632_v13  ;;  %1074 = vmatprep.subr.mxu1 %v634_v14  ;;  %v467_v13 = vld [vmem:[#allocation8 + $0x340] sm:$0xff]  ;;  %v469_v14 = vld [vmem:[#allocation8 + $0x350] sm:$0xff] }
 0x191   :  { %1004 = vmatpush2.msra.mxu0 %v631_v15  ;;  %1075 = vmatpush2.msra.mxu1 %v633_v16  ;;  %v456_v15 = vld [vmem:[#allocation8 + $0x2e8] sm:$0xff]  ;;  %v458_v16 = vld [vmem:[#allocation8 + $0x2f8] sm:$0xff] }
 0x192   :  { %1005 = vmatprep.subr.mxu0 %v620_v17  ;;  %1076 = vmatprep.subr.mxu1 %v622_v18  ;;  %v455_v17 = vld [vmem:[#allocation8 + $0x2e0] sm:$0xff]  ;;  %v457_v18 = vld [vmem:[#allocation8 + $0x2f0] sm:$0xff] }
 0x193   :  { %1006 = vmatpush2.msra.mxu0 %v619_v19  ;;  %1077 = vmatpush2.msra.mxu1 %v621_v20  ;;  %v444_v19 = vld [vmem:[#allocation8 + $0x288] sm:$0xff]  ;;  %v446_v20 = vld [vmem:[#allocation8 + $0x298] sm:$0xff] }
 0x194   :  { %1007 = vmatprep.subr.mxu0 %v608_v21  ;;  %1078 = vmatprep.subr.mxu1 %v610_v25  ;;  %v443_v21 = vld [vmem:[#allocation8 + $0x280] sm:$0xff]  ;;  %v445_v25 = vld [vmem:[#allocation8 + $0x290] sm:$0xff] }
 0x195   :  { %1008 = vmatpush2.msra.mxu0 %v607_v27  ;;  %1079 = vmatpush2.msra.mxu1 %v609_v28  ;;  %v432_v27 = vld [vmem:[#allocation8 + $0x228] sm:$0xff]  ;;  %v434_v28 = vld [vmem:[#allocation8 + $0x238] sm:$0xff] }
 0x196   :  { %1009 = vmatprep.subr.mxu0 %v596_v29  ;;  %1080 = vmatprep.subr.mxu1 %v598_v30  ;;  %v431_v29 = vld [vmem:[#allocation8 + $0x220] sm:$0xff]  ;;  %v433_v30 = vld [vmem:[#allocation8 + $0x230] sm:$0xff] }
 0x197   :  { %1010 = vmatpush2.msra.mxu0 %v595_v31  ;;  %1081 = vmatpush2.msra.mxu1 %v597_v32  ;;  %v420_v31 = vld [vmem:[#allocation8 + $0x1c8] sm:$0xff]  ;;  %v422_v32 = vld [vmem:[#allocation8 + $0x1d8] sm:$0xff] }
 0x198   :  { %1011 = vmatprep.subr.mxu0 %v584_v35  ;;  %1082 = vmatprep.subr.mxu1 %v586_v36  ;;  %v419_v35 = vld [vmem:[#allocation8 + $0x1c0] sm:$0xff]  ;;  %v421_v36 = vld [vmem:[#allocation8 + $0x1d0] sm:$0xff] }
 0x199   :  { %1012 = vmatpush2.msra.mxu0 %v583_v37  ;;  %1083 = vmatpush2.msra.mxu1 %v585_v38  ;;  %v408_v37 = vld [vmem:[#allocation8 + $0x168] sm:$0xff]  ;;  %v410_v38 = vld [vmem:[#allocation8 + $0x178] sm:$0xff] }
 0x19a   :  { %1013 = vmatprep.subr.mxu0 %v572_v39  ;;  %1084 = vmatprep.subr.mxu1 %v574_v40  ;;  %v407_v39 = vld [vmem:[#allocation8 + $0x160] sm:$0xff]  ;;  %v409_v40 = vld [vmem:[#allocation8 + $0x170] sm:$0xff] }
 0x19b   :  { %1014 = vmatpush2.msra.mxu0 %v571_v41  ;;  %1085 = vmatpush2.msra.mxu1 %v573_v42  ;;  %v396_v41 = vld [vmem:[#allocation8 + $0x108] sm:$0xff]  ;;  %v398_v42 = vld [vmem:[#allocation8 + $0x118] sm:$0xff] }
 0x19c   :  { %1015 = vmatprep.subr.mxu0 %v560_v43  ;;  %1086 = vmatprep.subr.mxu1 %v562_v44  ;;  %v395_v43 = vld [vmem:[#allocation8 + $0x100] sm:$0xff]  ;;  %v397_v44 = vld [vmem:[#allocation8 + $0x110] sm:$0xff] }
 0x19d   :  { %1016 = vmatpush2.msra.mxu0 %v559_v45  ;;  %1087 = vmatpush2.msra.mxu1 %v561_v46  ;;  %v384_v45 = vld [vmem:[#allocation8 + $0xa8] sm:$0xff]  ;;  %v386_v46 = vld [vmem:[#allocation8 + $0xb8] sm:$0xff] }
 0x19e   :  { %1018 = vmatmul.mubr.f32.vlgmr.msra.gmra.mxu0 %v2934_v34  ;;  %1089 = vmatmul.mubr.f32.vlgmr.msra.gmra.mxu1 %v2934_v34 }
 0x19f   :  { %1095 = vmatprep.subr.mxu0 %v552_v47  ;;  %1166 = vmatprep.subr.mxu1 %v554_v48  ;;  %v383_v47 = vld [vmem:[#allocation8 + $0xa0] sm:$0xff]  ;;  %v385_v48 = vld [vmem:[#allocation8 + $0xb0] sm:$0xff] }
 0x1a0   :  { %1096 = vmatpush1.msra.mxu0 %v551_v49  ;;  %1159 = vmatprep.mubr.f32.mxu0 %v2932_v33  ;;  %v372_v49 = vld [vmem:[#allocation8 + $0x48] sm:$0xff] }
 0x1a1   :  { %1167 = vmatpush1.msra.mxu1 %v553_v50  ;;  %1230 = vmatprep.mubr.f32.mxu1 %v2932_v33  ;;  %v503_v33 = vld [vmem:[#allocation8 + $0x460] sm:$0xff]  ;;  %v374_v50 = vld [vmem:[#allocation8 + $0x58] sm:$0xff] }
 0x1a2   :  { %1097 = vmatprep.subr.mxu0 %v540_v51  ;;  %1168 = vmatprep.subr.mxu1 %v542_v52  ;;  %v371_v51 = vld [vmem:[#allocation8 + $0x40] sm:$0xff]  ;;  %v373_v52 = vld [vmem:[#allocation8 + $0x50] sm:$0xff] }
 0x1a3   :  { %1098 = vmatpush1.msra.mxu0 %v539_v53  ;;  %1169 = vmatpush1.msra.mxu1 %v541_v54  ;;  %v744_v53 = vld [vmem:[#allocation8 + $0xbe8] sm:$0xff]  ;;  %v746_v54 = vld [vmem:[#allocation8 + $0xbf8] sm:$0xff] }
 0x1a4   :  { %1099 = vmatprep.subr.mxu0 %v528_v55  ;;  %1170 = vmatprep.subr.mxu1 %v530_v56  ;;  %v743_v55 = vld [vmem:[#allocation8 + $0xbe0] sm:$0xff]  ;;  %v745_v56 = vld [vmem:[#allocation8 + $0xbf0] sm:$0xff] }
 0x1a5   :  { %1100 = vmatpush1.msra.mxu0 %v527_v57  ;;  %1171 = vmatpush1.msra.mxu1 %v529_v58  ;;  %v732_v57 = vld [vmem:[#allocation8 + $0xb88] sm:$0xff]  ;;  %v734_v58 = vld [vmem:[#allocation8 + $0xb98] sm:$0xff] }
 0x1a6   :  { %1101 = vmatprep.subr.mxu0 %v516_v59  ;;  %1172 = vmatprep.subr.mxu1 %v518_v60  ;;  %v731_v59 = vld [vmem:[#allocation8 + $0xb80] sm:$0xff]  ;;  %v733_v60 = vld [vmem:[#allocation8 + $0xb90] sm:$0xff] }
 0x1a7   :  { %1102 = vmatpush1.msra.mxu0 %v515_v61  ;;  %1173 = vmatpush1.msra.mxu1 %v517_v62  ;;  %v720_v61 = vld [vmem:[#allocation8 + $0xb28] sm:$0xff]  ;;  %v722_v62 = vld [vmem:[#allocation8 + $0xb38] sm:$0xff] }
 0x1a8   :  { %1103 = vmatprep.subr.mxu0 %v504_v63  ;;  %1174 = vmatprep.subr.mxu1 %v506_v1  ;;  %v719_v63 = vld [vmem:[#allocation8 + $0xb20] sm:$0xff]  ;;  %v721_v1 = vld [vmem:[#allocation8 + $0xb30] sm:$0xff] }
 0x1a9   :  { %1104 = vmatpush1.msra.mxu0 %v503_v33  ;;  %1175 = vmatpush1.msra.mxu1 %v505_v2  ;;  %v708_v33 = vld [vmem:[#allocation8 + $0xac8] sm:$0xff]  ;;  %v710_v2 = vld [vmem:[#allocation8 + $0xad8] sm:$0xff] }
 0x1aa   :  { %1105 = vmatprep.subr.mxu0 %v492_v3  ;;  %1176 = vmatprep.subr.mxu1 %v494_v4  ;;  %v707_v3 = vld [vmem:[#allocation8 + $0xac0] sm:$0xff]  ;;  %v709_v4 = vld [vmem:[#allocation8 + $0xad0] sm:$0xff] }
 0x1ab   :  { %1106 = vmatpush1.msra.mxu0 %v491_v5  ;;  %1177 = vmatpush1.msra.mxu1 %v493_v6  ;;  %v696_v5 = vld [vmem:[#allocation8 + $0xa68] sm:$0xff]  ;;  %v698_v6 = vld [vmem:[#allocation8 + $0xa78] sm:$0xff] }
 0x1ac   :  { %1107 = vmatprep.subr.mxu0 %v480_v7  ;;  %1178 = vmatprep.subr.mxu1 %v482_v8  ;;  %v695_v7 = vld [vmem:[#allocation8 + $0xa60] sm:$0xff]  ;;  %v697_v8 = vld [vmem:[#allocation8 + $0xa70] sm:$0xff] }
 0x1ad   :  { %1108 = vmatpush1.msra.mxu0 %v479_v9  ;;  %1179 = vmatpush1.msra.mxu1 %v481_v10  ;;  %v684_v9 = vld [vmem:[#allocation8 + $0xa08] sm:$0xff]  ;;  %v686_v10 = vld [vmem:[#allocation8 + $0xa18] sm:$0xff] }
 0x1ae   :  { %1109 = vmatprep.subr.mxu0 %v468_v11  ;;  %1180 = vmatprep.subr.mxu1 %v470_v12  ;;  %v683_v11 = vld [vmem:[#allocation8 + $0xa00] sm:$0xff]  ;;  %v685_v12 = vld [vmem:[#allocation8 + $0xa10] sm:$0xff] }
 0x1af   :  { %1110 = vmatpush1.msra.mxu0 %v467_v13  ;;  %1181 = vmatpush1.msra.mxu1 %v469_v14  ;;  %v672_v13 = vld [vmem:[#allocation8 + $0x9a8] sm:$0xff]  ;;  %v674_v14 = vld [vmem:[#allocation8 + $0x9b8] sm:$0xff] }
 0x1b0   :  { %1111 = vmatprep.subr.mxu0 %v456_v15  ;;  %1182 = vmatprep.subr.mxu1 %v458_v16  ;;  %v671_v15 = vld [vmem:[#allocation8 + $0x9a0] sm:$0xff]  ;;  %v673_v16 = vld [vmem:[#allocation8 + $0x9b0] sm:$0xff] }
 0x1b1   :  { %1112 = vmatpush1.msra.mxu0 %v455_v17  ;;  %1183 = vmatpush1.msra.mxu1 %v457_v18  ;;  %v660_v17 = vld [vmem:[#allocation8 + $0x948] sm:$0xff]  ;;  %v662_v18 = vld [vmem:[#allocation8 + $0x958] sm:$0xff] }
 0x1b2   :  { %1113 = vmatprep.subr.mxu0 %v444_v19  ;;  %1184 = vmatprep.subr.mxu1 %v446_v20  ;;  %v659_v19 = vld [vmem:[#allocation8 + $0x940] sm:$0xff]  ;;  %v661_v20 = vld [vmem:[#allocation8 + $0x950] sm:$0xff] }
 0x1b3   :  { %1114 = vmatpush1.msra.mxu0 %v443_v21  ;;  %1185 = vmatpush1.msra.mxu1 %v445_v25  ;;  %v648_v21 = vld [vmem:[#allocation8 + $0x8e8] sm:$0xff]  ;;  %v650_v25 = vld [vmem:[#allocation8 + $0x8f8] sm:$0xff] }
 0x1b4   :  { %1115 = vmatprep.subr.mxu0 %v432_v27  ;;  %1186 = vmatprep.subr.mxu1 %v434_v28  ;;  %v647_v27 = vld [vmem:[#allocation8 + $0x8e0] sm:$0xff]  ;;  %v649_v28 = vld [vmem:[#allocation8 + $0x8f0] sm:$0xff] }
 0x1b5   :  { %1116 = vmatpush1.msra.mxu0 %v431_v29  ;;  %1187 = vmatpush1.msra.mxu1 %v433_v30  ;;  %v636_v29 = vld [vmem:[#allocation8 + $0x888] sm:$0xff]  ;;  %v638_v30 = vld [vmem:[#allocation8 + $0x898] sm:$0xff] }
 0x1b6   :  { %1117 = vmatprep.subr.mxu0 %v420_v31  ;;  %1188 = vmatprep.subr.mxu1 %v422_v32  ;;  %v635_v31 = vld [vmem:[#allocation8 + $0x880] sm:$0xff]  ;;  %v637_v32 = vld [vmem:[#allocation8 + $0x890] sm:$0xff] }
 0x1b7   :  { %1118 = vmatpush1.msra.mxu0 %v419_v35  ;;  %1189 = vmatpush1.msra.mxu1 %v421_v36  ;;  %v624_v35 = vld [vmem:[#allocation8 + $0x828] sm:$0xff]  ;;  %v626_v36 = vld [vmem:[#allocation8 + $0x838] sm:$0xff] }
 0x1b8   :  { %1119 = vmatprep.subr.mxu0 %v408_v37  ;;  %1190 = vmatprep.subr.mxu1 %v410_v38  ;;  %v623_v37 = vld [vmem:[#allocation8 + $0x820] sm:$0xff]  ;;  %v625_v38 = vld [vmem:[#allocation8 + $0x830] sm:$0xff] }
 0x1b9   :  { %1120 = vmatpush1.msra.mxu0 %v407_v39  ;;  %1191 = vmatpush1.msra.mxu1 %v409_v40  ;;  %v612_v39 = vld [vmem:[#allocation8 + $0x7c8] sm:$0xff]  ;;  %v614_v40 = vld [vmem:[#allocation8 + $0x7d8] sm:$0xff] }
 0x1ba   :  { %1121 = vmatprep.subr.mxu0 %v396_v41  ;;  %1192 = vmatprep.subr.mxu1 %v398_v42  ;;  %v611_v41 = vld [vmem:[#allocation8 + $0x7c0] sm:$0xff]  ;;  %v613_v42 = vld [vmem:[#allocation8 + $0x7d0] sm:$0xff] }
 0x1bb   :  { %1122 = vmatpush1.msra.mxu0 %v395_v43  ;;  %1193 = vmatpush1.msra.mxu1 %v397_v44  ;;  %v600_v43 = vld [vmem:[#allocation8 + $0x768] sm:$0xff]  ;;  %v602_v44 = vld [vmem:[#allocation8 + $0x778] sm:$0xff] }
 0x1bc   :  { %1123 = vmatprep.subr.mxu0 %v384_v45  ;;  %1194 = vmatprep.subr.mxu1 %v386_v46  ;;  %v599_v45 = vld [vmem:[#allocation8 + $0x760] sm:$0xff]  ;;  %v601_v46 = vld [vmem:[#allocation8 + $0x770] sm:$0xff] }
 0x1bd   :  { %1124 = vmatpush1.msra.mxu0 %v383_v47  ;;  %1195 = vmatpush1.msra.mxu1 %v385_v48  ;;  %v588_v47 = vld [vmem:[#allocation8 + $0x708] sm:$0xff]  ;;  %v590_v48 = vld [vmem:[#allocation8 + $0x718] sm:$0xff] }
 0x1be   :  { %1125 = vmatprep.subr.mxu0 %v372_v49  ;;  %1196 = vmatprep.subr.mxu1 %v374_v50  ;;  %v587_v49 = vld [vmem:[#allocation8 + $0x700] sm:$0xff]  ;;  %v589_v50 = vld [vmem:[#allocation8 + $0x710] sm:$0xff] }
 0x1bf   :  { %1126 = vmatpush1.msra.mxu0 %v371_v51  ;;  %1197 = vmatpush1.msra.mxu1 %v373_v52  ;;  %v576_v51 = vld [vmem:[#allocation8 + $0x6a8] sm:$0xff]  ;;  %v578_v52 = vld [vmem:[#allocation8 + $0x6b8] sm:$0xff] }
 0x1c0   :  { %1127 = vmatprep.subr.mxu0 %v744_v53  ;;  %1198 = vmatprep.subr.mxu1 %v746_v54  ;;  %v575_v53 = vld [vmem:[#allocation8 + $0x6a0] sm:$0xff]  ;;  %v577_v54 = vld [vmem:[#allocation8 + $0x6b0] sm:$0xff] }
 0x1c1   :  { %1128 = vmatpush2.msra.mxu0 %v743_v55  ;;  %1199 = vmatpush2.msra.mxu1 %v745_v56  ;;  %v564_v55 = vld [vmem:[#allocation8 + $0x648] sm:$0xff]  ;;  %v566_v56 = vld [vmem:[#allocation8 + $0x658] sm:$0xff] }
 0x1c2   :  { %1129 = vmatprep.subr.mxu0 %v732_v57  ;;  %1200 = vmatprep.subr.mxu1 %v734_v58  ;;  %v563_v57 = vld [vmem:[#allocation8 + $0x640] sm:$0xff]  ;;  %v565_v58 = vld [vmem:[#allocation8 + $0x650] sm:$0xff] }
 0x1c3   :  { %1130 = vmatpush2.msra.mxu0 %v731_v59  ;;  %1201 = vmatpush2.msra.mxu1 %v733_v60  ;;  %v1849_v59 = vld [vmem:[#allocation11 + $0x2d8] sm:$0xff]  ;;  %v1851_v60 = vld [vmem:[#allocation11 + $0x2e8] sm:$0xff] }
 0x1c4   :  { %1131 = vmatprep.subr.mxu0 %v720_v61  ;;  %1202 = vmatprep.subr.mxu1 %v722_v62  ;;  %v1848_v61 = vld [vmem:[#allocation11 + $0x2d0] sm:$0xff]  ;;  %v1850_v62 = vld [vmem:[#allocation11 + $0x2e0] sm:$0xff] }
 0x1c5   :  { %1132 = vmatpush2.msra.mxu0 %v719_v63  ;;  %1203 = vmatpush2.msra.mxu1 %v721_v1  ;;  %v1843_v63 = vld [vmem:[#allocation11 + $0x2a8] sm:$0xff]  ;;  %v1845_v1 = vld [vmem:[#allocation11 + $0x2b8] sm:$0xff] }
 0x1c6   :  { %1133 = vmatprep.subr.mxu0 %v708_v33  ;;  %1204 = vmatprep.subr.mxu1 %v710_v2  ;;  %v1842_v33 = vld [vmem:[#allocation11 + $0x2a0] sm:$0xff]  ;;  %v1844_v2 = vld [vmem:[#allocation11 + $0x2b0] sm:$0xff] }
 0x1c7   :  { %1134 = vmatpush2.msra.mxu0 %v707_v3  ;;  %1205 = vmatpush2.msra.mxu1 %v709_v4  ;;  %v1837_v3 = vld [vmem:[#allocation11 + $0x278] sm:$0xff]  ;;  %v1839_v4 = vld [vmem:[#allocation11 + $0x288] sm:$0xff] }
 0x1c8   :  { %1135 = vmatprep.subr.mxu0 %v696_v5  ;;  %1206 = vmatprep.subr.mxu1 %v698_v6  ;;  %v1836_v5 = vld [vmem:[#allocation11 + $0x270] sm:$0xff]  ;;  %v1838_v6 = vld [vmem:[#allocation11 + $0x280] sm:$0xff] }
 0x1c9   :  { %1136 = vmatpush2.msra.mxu0 %v695_v7  ;;  %1207 = vmatpush2.msra.mxu1 %v697_v8  ;;  %v1831_v7 = vld [vmem:[#allocation11 + $0x248] sm:$0xff]  ;;  %v1833_v8 = vld [vmem:[#allocation11 + $0x258] sm:$0xff] }
 0x1ca   :  { %1137 = vmatprep.subr.mxu0 %v684_v9  ;;  %1208 = vmatprep.subr.mxu1 %v686_v10  ;;  %v1832_v9 = vld [vmem:[#allocation11 + $0x250] sm:$0xff]  ;;  %v1825_v10 = vld [vmem:[#allocation11 + $0x218] sm:$0xff] }
 0x1cb   :  { %1138 = vmatpush2.msra.mxu0 %v683_v11  ;;  %1209 = vmatpush2.msra.mxu1 %v685_v12  ;;  %v1827_v11 = vld [vmem:[#allocation11 + $0x228] sm:$0xff]  ;;  %v1824_v12 = vld [vmem:[#allocation11 + $0x210] sm:$0xff] }
 0x1cc   :  { %1139 = vmatprep.subr.mxu0 %v672_v13  ;;  %1210 = vmatprep.subr.mxu1 %v674_v14  ;;  %v1826_v13 = vld [vmem:[#allocation11 + $0x220] sm:$0xff]  ;;  %v1819_v14 = vld [vmem:[#allocation11 + $0x1e8] sm:$0xff] }
 0x1cd   :  { %1140 = vmatpush2.msra.mxu0 %v671_v15  ;;  %1211 = vmatpush2.msra.mxu1 %v673_v16  ;;  %v1821_v15 = vld [vmem:[#allocation11 + $0x1f8] sm:$0xff]  ;;  %v1818_v16 = vld [vmem:[#allocation11 + $0x1e0] sm:$0xff] }
 0x1ce   :  { %1141 = vmatprep.subr.mxu0 %v660_v17  ;;  %1212 = vmatprep.subr.mxu1 %v662_v18  ;;  %v1820_v17 = vld [vmem:[#allocation11 + $0x1f0] sm:$0xff]  ;;  %v1813_v18 = vld [vmem:[#allocation11 + $0x1b8] sm:$0xff] }
 0x1cf   :  { %1142 = vmatpush2.msra.mxu0 %v659_v19  ;;  %1213 = vmatpush2.msra.mxu1 %v661_v20  ;;  %v1815_v19 = vld [vmem:[#allocation11 + $0x1c8] sm:$0xff]  ;;  %v1812_v20 = vld [vmem:[#allocation11 + $0x1b0] sm:$0xff] }
 0x1d0   :  { %1143 = vmatprep.subr.mxu0 %v648_v21  ;;  %1214 = vmatprep.subr.mxu1 %v650_v25  ;;  %v1814_v21 = vld [vmem:[#allocation11 + $0x1c0] sm:$0xff]  ;;  %v1807_v25 = vld [vmem:[#allocation11 + $0x188] sm:$0xff] }
 0x1d1   :  { %1144 = vmatpush2.msra.mxu0 %v647_v27  ;;  %1215 = vmatpush2.msra.mxu1 %v649_v28  ;;  %v1809_v27 = vld [vmem:[#allocation11 + $0x198] sm:$0xff]  ;;  %v1806_v28 = vld [vmem:[#allocation11 + $0x180] sm:$0xff] }
 0x1d2   :  { %1145 = vmatprep.subr.mxu0 %v636_v29  ;;  %1216 = vmatprep.subr.mxu1 %v638_v30  ;;  %v1808_v29 = vld [vmem:[#allocation11 + $0x190] sm:$0xff]  ;;  %v1801_v30 = vld [vmem:[#allocation11 + $0x158] sm:$0xff] }
 0x1d3   :  { %1146 = vmatpush2.msra.mxu0 %v635_v31  ;;  %1217 = vmatpush2.msra.mxu1 %v637_v32  ;;  %v1803_v31 = vld [vmem:[#allocation11 + $0x168] sm:$0xff]  ;;  %v1800_v32 = vld [vmem:[#allocation11 + $0x150] sm:$0xff] }
 0x1d4   :  { %1147 = vmatprep.subr.mxu0 %v624_v35  ;;  %1218 = vmatprep.subr.mxu1 %v626_v36  ;;  %v1802_v35 = vld [vmem:[#allocation11 + $0x160] sm:$0xff]  ;;  %v1795_v36 = vld [vmem:[#allocation11 + $0x128] sm:$0xff] }
 0x1d5   :  { %1148 = vmatpush2.msra.mxu0 %v623_v37  ;;  %1219 = vmatpush2.msra.mxu1 %v625_v38  ;;  %v1797_v37 = vld [vmem:[#allocation11 + $0x138] sm:$0xff]  ;;  %v1794_v38 = vld [vmem:[#allocation11 + $0x120] sm:$0xff] }
 0x1d6   :  { %1149 = vmatprep.subr.mxu0 %v612_v39  ;;  %1220 = vmatprep.subr.mxu1 %v614_v40  ;;  %v1796_v39 = vld [vmem:[#allocation11 + $0x130] sm:$0xff]  ;;  %v1789_v40 = vld [vmem:[#allocation11 + $0xf8] sm:$0xff] }
 0x1d7   :  { %1150 = vmatpush2.msra.mxu0 %v611_v41  ;;  %1221 = vmatpush2.msra.mxu1 %v613_v42  ;;  %v1791_v41 = vld [vmem:[#allocation11 + $0x108] sm:$0xff]  ;;  %v1788_v42 = vld [vmem:[#allocation11 + $0xf0] sm:$0xff] }
 0x1d8   :  { %1151 = vmatprep.subr.mxu0 %v600_v43  ;;  %1222 = vmatprep.subr.mxu1 %v602_v44  ;;  %v1790_v43 = vld [vmem:[#allocation11 + $0x100] sm:$0xff]  ;;  %v1783_v44 = vld [vmem:[#allocation11 + $0xc8] sm:$0xff] }
 0x1d9   :  { %1152 = vmatpush2.msra.mxu0 %v599_v45  ;;  %1223 = vmatpush2.msra.mxu1 %v601_v46  ;;  %v1785_v45 = vld [vmem:[#allocation11 + $0xd8] sm:$0xff]  ;;  %v2949_v46 = vsub.s32 3, %v2922_v23 }
 0x1da   :  { %1153 = vmatprep.subr.mxu0 %v588_v47  ;;  %1224 = vmatprep.subr.mxu1 %v590_v48  ;;  %v1782_v47 = vld [vmem:[#allocation11 + $0xc0] sm:$0xff]  ;;  %v1784_v48 = vld [vmem:[#allocation11 + $0xd0] sm:$0xff] }
 0x1db   :  { %1154 = vmatpush2.msra.mxu0 %v587_v49  ;;  %1225 = vmatpush2.msra.mxu1 %v589_v50  ;;  %v2951_v49 = vpop.f32.mrf.mxu1  ;;  %v1777_v50 = vld [vmem:[#allocation11 + $0x98] sm:$0xff] }
 0x1dc   :  { %1155 = vmatprep.subr.mxu0 %v576_v51  ;;  %1226 = vmatprep.subr.mxu1 %v578_v52  ;;  %v1779_v51 = vld [vmem:[#allocation11 + $0xa8] sm:$0xff]  ;;  %v1776_v52 = vld [vmem:[#allocation11 + $0x90] sm:$0xff] }
 0x1dd   :  { %1156 = vmatpush2.msra.mxu0 %v575_v53  ;;  %1227 = vmatpush2.msra.mxu1 %v577_v54  ;;  %v1778_v53 = vld [vmem:[#allocation11 + $0xa0] sm:$0xff]  ;;  %v1771_v54 = vld [vmem:[#allocation11 + $0x68] sm:$0xff] }
 0x1de   :  { %1157 = vmatprep.subr.mxu0 %v564_v55  ;;  %1228 = vmatprep.subr.mxu1 %v566_v56  ;;  %v1773_v55 = vld [vmem:[#allocation11 + $0x78] sm:$0xff]  ;;  %v2953_v56 = vld [vmem:[#allocation7] sm:$0xf] }
 0x1df   :  { %1158 = vmatpush2.msra.mxu0 %v563_v57  ;;  %1229 = vmatpush2.msra.mxu1 %v565_v58  ;;  %v208_v57 = vrot.slane %v2953_v56, %v2949_v46  ;;  %v1770_v58 = vld [vmem:[#allocation11 + $0x60] sm:$0xff] }
 0x1e0   :  { %1160 = vmatmul.mubr.f32.vlgmr.msra.gmra.mxu0 %v2934_v34  ;;  %1231 = vmatmul.mubr.f32.vlgmr.msra.gmra.mxu1 %v2934_v34  ;;  %v1830_v34 = vld [vmem:[#allocation11 + $0x240] sm:$0xff] }
 0x1e1   :  { %1982 = vmatprep.subr.mxu0 %v1849_v59  ;;  %2053 = vmatprep.subr.mxu1 %v1851_v60  ;;  %v1772_v59 = vld [vmem:[#allocation11 + $0x70] sm:$0xff]  ;;  %v356_v60 = vpop.f32.mrf.mxu1 }
 0x1e2   :  { %1983 = vmatpush1.msra.mxu0 %v1848_v61  ;;  %2054 = vmatpush1.msra.mxu1 %v1850_v62  ;;  %v1765_v61 = vld [vmem:[#allocation11 + $0x38] sm:$0xff]  ;;  %v1767_v62 = vld [vmem:[#allocation11 + $0x48] sm:$0xff] }
 0x1e3   :  { %1984 = vmatprep.subr.mxu0 %v1843_v63  ;;  %2055 = vmatprep.subr.mxu1 %v1845_v1  ;;  %v1764_v63 = vld [vmem:[#allocation11 + $0x30] sm:$0xff]  ;;  %v1766_v1 = vld [vmem:[#allocation11 + $0x40] sm:$0xff] }
 0x1e4   :  { %1985 = vmatpush1.msra.mxu0 %v1842_v33  ;;  %2056 = vmatpush1.msra.mxu1 %v1844_v2  ;;  %v357_v33 = vadd.f32 %v356_v60, %v208_v57  ;;  %v1759_v2 = vld [vmem:[#allocation11 + $0x8] sm:$0xff]  ;;  %v2962_v57 = vsub.s32 2, %v2922_v23 }
 0x1e5   :  { %1986 = vmatprep.subr.mxu0 %v1837_v3  ;;  %2057 = vmatprep.subr.mxu1 %v1839_v4  ;;  %v1761_v3 = vld [vmem:[#allocation11 + $0x18] sm:$0xff]  ;;  %v1758_v4 = vld [vmem:[#allocation11] sm:$0xff]  ;;  %v1879_v60 = vld [vmem:[#allocation11 + $0x3c8] sm:$0xff] }
 0x1e6   :  { %1987 = vmatpush1.msra.mxu0 %v1836_v5  ;;  %2058 = vmatpush1.msra.mxu1 %v1838_v6  ;;  %v1760_v5 = vld [vmem:[#allocation11 + $0x10] sm:$0xff]  ;;  %v1945_v6 = vld [vmem:[#allocation11 + $0x5d8] sm:$0xff] }
 0x1e7   :  { %1988 = vmatprep.subr.mxu0 %v1831_v7  ;;  %2059 = vmatprep.subr.mxu1 %v1833_v8  ;;  %v1947_v7 = vld [vmem:[#allocation11 + $0x5e8] sm:$0xff]  ;;  %v1944_v8 = vld [vmem:[#allocation11 + $0x5d0] sm:$0xff] }
 0x1e8   :  { %1989 = vmatpush1.msra.mxu0 %v1830_v34  ;;  %2060 = vmatpush1.msra.mxu1 %v1832_v9  ;;  %v1946_v34 = vld [vmem:[#allocation11 + $0x5e0] sm:$0xff]  ;;  %v2957_v9 = vmax.f32 %v357_v33, 0.0  ;;  %v1875_v33 = vld [vmem:[#allocation11 + $0x3a8] sm:$0xff] }
 0x1e9   :  { %1990 = vmatprep.subr.mxu0 %v1825_v10  ;;  %2061 = vmatprep.subr.mxu1 %v1827_v11  ;;  %v1939_v10 = vld [vmem:[#allocation11 + $0x5a8] sm:$0xff]  ;;  %v1941_v11 = vld [vmem:[#allocation11 + $0x5b8] sm:$0xff] }
 0x1ea   :  { %1991 = vmatpush1.msra.mxu0 %v1824_v12  ;;  %2062 = vmatpush1.msra.mxu1 %v1826_v13  ;;  %v1938_v12 = vld [vmem:[#allocation11 + $0x5a0] sm:$0xff]  ;;  %v1940_v13 = vld [vmem:[#allocation11 + $0x5b0] sm:$0xff] }
 0x1eb   :  { %1992 = vmatprep.subr.mxu0 %v1819_v14  ;;  %2063 = vmatprep.subr.mxu1 %v1821_v15  ;;  %v1933_v14 = vld [vmem:[#allocation11 + $0x578] sm:$0xff]  ;;  %v1935_v15 = vld [vmem:[#allocation11 + $0x588] sm:$0xff] }
 0x1ec   :  { %1993 = vmatpush1.msra.mxu0 %v1818_v16  ;;  %2064 = vmatpush1.msra.mxu1 %v1820_v17  ;;  %v1932_v16 = vld [vmem:[#allocation11 + $0x570] sm:$0xff]  ;;  %v1934_v17 = vld [vmem:[#allocation11 + $0x580] sm:$0xff] }
 0x1ed   :  { %1994 = vmatprep.subr.mxu0 %v1813_v18  ;;  %2065 = vmatprep.subr.mxu1 %v1815_v19  ;;  %v1927_v18 = vld [vmem:[#allocation11 + $0x548] sm:$0xff]  ;;  %v1929_v19 = vld [vmem:[#allocation11 + $0x558] sm:$0xff] }
 0x1ee   :  { %1995 = vmatpush1.msra.mxu0 %v1812_v20  ;;  %2066 = vmatpush1.msra.mxu1 %v1814_v21  ;;  %v1926_v20 = vld [vmem:[#allocation11 + $0x540] sm:$0xff]  ;;  %v1928_v21 = vld [vmem:[#allocation11 + $0x550] sm:$0xff] }
 0x1ef   :  { %1996 = vmatprep.subr.mxu0 %v1807_v25  ;;  %2067 = vmatprep.subr.mxu1 %v1809_v27  ;;  %v1921_v25 = vld [vmem:[#allocation11 + $0x518] sm:$0xff]  ;;  %v1923_v27 = vld [vmem:[#allocation11 + $0x528] sm:$0xff] }
 0x1f0   :  { %1997 = vmatpush1.msra.mxu0 %v1806_v28  ;;  %2068 = vmatpush1.msra.mxu1 %v1808_v29  ;;  %v1920_v28 = vld [vmem:[#allocation11 + $0x510] sm:$0xff]  ;;  %v1922_v29 = vld [vmem:[#allocation11 + $0x520] sm:$0xff] }
 0x1f1   :  { %1998 = vmatprep.subr.mxu0 %v1801_v30  ;;  %2069 = vmatprep.subr.mxu1 %v1803_v31  ;;  %v1915_v30 = vld [vmem:[#allocation11 + $0x4e8] sm:$0xff]  ;;  %v1917_v31 = vld [vmem:[#allocation11 + $0x4f8] sm:$0xff] }
 0x1f2   :  { %1999 = vmatpush1.msra.mxu0 %v1800_v32  ;;  %2070 = vmatpush1.msra.mxu1 %v1802_v35  ;;  %v1914_v32 = vld [vmem:[#allocation11 + $0x4e0] sm:$0xff]  ;;  %v1916_v35 = vld [vmem:[#allocation11 + $0x4f0] sm:$0xff] }
 0x1f3   :  { %2000 = vmatprep.subr.mxu0 %v1795_v36  ;;  %2071 = vmatprep.subr.mxu1 %v1797_v37  ;;  %v1909_v36 = vld [vmem:[#allocation11 + $0x4b8] sm:$0xff]  ;;  %v1911_v37 = vld [vmem:[#allocation11 + $0x4c8] sm:$0xff] }
 0x1f4   :  { %2001 = vmatpush1.msra.mxu0 %v1794_v38  ;;  %2072 = vmatpush1.msra.mxu1 %v1796_v39  ;;  %v1908_v38 = vld [vmem:[#allocation11 + $0x4b0] sm:$0xff]  ;;  %v1910_v39 = vld [vmem:[#allocation11 + $0x4c0] sm:$0xff] }
 0x1f5   :  { %2002 = vmatprep.subr.mxu0 %v1789_v40  ;;  %2073 = vmatprep.subr.mxu1 %v1791_v41  ;;  %v1903_v40 = vld [vmem:[#allocation11 + $0x488] sm:$0xff]  ;;  %v1905_v41 = vld [vmem:[#allocation11 + $0x498] sm:$0xff] }
 0x1f6   :  { %2003 = vmatpush1.msra.mxu0 %v1788_v42  ;;  %2074 = vmatpush1.msra.mxu1 %v1790_v43  ;;  %v1902_v42 = vld [vmem:[#allocation11 + $0x480] sm:$0xff]  ;;  %v1904_v43 = vld [vmem:[#allocation11 + $0x490] sm:$0xff] }
 0x1f7   :  { %2004 = vmatprep.subr.mxu0 %v1783_v44  ;;  %2075 = vmatprep.subr.mxu1 %v1785_v45  ;;  %v1897_v44 = vld [vmem:[#allocation11 + $0x458] sm:$0xff]  ;;  %v1899_v45 = vld [vmem:[#allocation11 + $0x468] sm:$0xff] }
 0x1f8   :  { %2005 = vmatpush1.msra.mxu0 %v1782_v47  ;;  %2076 = vmatpush1.msra.mxu1 %v1784_v48  ;;  %v1896_v47 = vld [vmem:[#allocation11 + $0x450] sm:$0xff]  ;;  %v1898_v48 = vld [vmem:[#allocation11 + $0x460] sm:$0xff] }
 0x1f9   :  { %2006 = vmatprep.subr.mxu0 %v1777_v50  ;;  %2077 = vmatprep.subr.mxu1 %v1779_v51  ;;  %v1891_v50 = vld [vmem:[#allocation11 + $0x428] sm:$0xff]  ;;  %v1893_v51 = vld [vmem:[#allocation11 + $0x438] sm:$0xff] }
 0x1fa   :  { %2007 = vmatpush1.msra.mxu0 %v1776_v52  ;;  %2078 = vmatpush1.msra.mxu1 %v1778_v53  ;;  %v1890_v52 = vld [vmem:[#allocation11 + $0x420] sm:$0xff]  ;;  %v1892_v53 = vld [vmem:[#allocation11 + $0x430] sm:$0xff] }
 0x1fb   :  { %2008 = vmatprep.subr.mxu0 %v1771_v54  ;;  %2079 = vmatprep.subr.mxu1 %v1773_v55  ;;  %v1885_v54 = vld [vmem:[#allocation11 + $0x3f8] sm:$0xff]  ;;  %v1887_v55 = vld [vmem:[#allocation11 + $0x408] sm:$0xff] }
 0x1fc   :  { %2009 = vmatpush1.msra.mxu0 %v1770_v58  ;;  %2080 = vmatpush1.msra.mxu1 %v1772_v59  ;;  %v1884_v58 = vld [vmem:[#allocation11 + $0x3f0] sm:$0xff]  ;;  %v1886_v59 = vld [vmem:[#allocation11 + $0x400] sm:$0xff] }
 0x1fd   :  { %2010 = vmatprep.subr.mxu0 %v1765_v61  ;;  %2081 = vmatprep.subr.mxu1 %v1767_v62  ;;  %v1881_v61 = vld [vmem:[#allocation11 + $0x3d8] sm:$0xff]  ;;  %v1878_v62 = vld [vmem:[#allocation11 + $0x3c0] sm:$0xff] }
 0x1fe   :  { %2011 = vmatpush1.msra.mxu0 %v1764_v63  ;;  %2082 = vmatpush1.msra.mxu1 %v1766_v1  ;;  %v1880_v63 = vld [vmem:[#allocation11 + $0x3d0] sm:$0xff]  ;;  %v1873_v1 = vld [vmem:[#allocation11 + $0x398] sm:$0xff] }
 0x1ff   :  { %2012 = vmatprep.subr.mxu0 %v1759_v2  ;;  %2083 = vmatprep.subr.mxu1 %v1761_v3  ;;  %v204_v2 = vrot.slane %v2953_v56, %v2962_v57  ;;  %v1872_v3 = vld [vmem:[#allocation11 + $0x390] sm:$0xff] }
 0x200   :  { %2013 = vmatpush1.msra.mxu0 %v1758_v4  ;;  %2084 = vmatpush1.msra.mxu1 %v1760_v5  ;;  %v1874_v4 = vld [vmem:[#allocation11 + $0x3a0] sm:$0xff]  ;;  %v1867_v5 = vld [vmem:[#allocation11 + $0x368] sm:$0xff]  ;;  %v1860_v56 = vld [vmem:[#allocation11 + $0x330] sm:$0xff] }
 0x201   :  { %2014 = vmatprep.subr.mxu0 %v1945_v6  ;;  %2085 = vmatprep.subr.mxu1 %v1947_v7  ;;  %v1869_v6 = vld [vmem:[#allocation11 + $0x378] sm:$0xff]  ;;  %v1866_v7 = vld [vmem:[#allocation11 + $0x360] sm:$0xff] }
 0x202   :  { %2015 = vmatpush2.msra.mxu0 %v1944_v8  ;;  %2086 = vmatpush2.msra.mxu1 %v1946_v34  ;;  %v1868_v8 = vld [vmem:[#allocation11 + $0x370] sm:$0xff]  ;;  %v1861_v34 = vld [vmem:[#allocation11 + $0x338] sm:$0xff] }
 0x203   :  { %2016 = vmatprep.subr.mxu0 %v1939_v10  ;;  %2087 = vmatprep.subr.mxu1 %v1941_v11  ;;  %v1863_v10 = vld [vmem:[#allocation11 + $0x348] sm:$0xff]  ;;  %v355_v11 = vadd.f32 %v2951_v49, %v204_v2  ;;  %v1852_v49 = vld [vmem:[#allocation11 + $0x2f0] sm:$0xff]  ;;  %v1925_v2 = vld [vmem:[#allocation11 + $0x538] sm:$0xff] }
 0x204   :  { %2017 = vmatpush2.msra.mxu0 %v1938_v12  ;;  %2046 = vmatprep.mubr.f32.mxu0 %v2957_v9  ;;  %v1862_v12 = vld [vmem:[#allocation11 + $0x340] sm:$0xff] }
 0x205   :  { %2088 = vmatpush2.msra.mxu1 %v1940_v13  ;;  %2117 = vmatprep.mubr.f32.mxu1 %v2957_v9  ;;  %v1855_v13 = vld [vmem:[#allocation11 + $0x308] sm:$0xff] }
 0x206   :  { %2018 = vmatprep.subr.mxu0 %v1933_v14  ;;  %2089 = vmatprep.subr.mxu1 %v1935_v15  ;;  %v1857_v14 = vld [vmem:[#allocation11 + $0x318] sm:$0xff]  ;;  %v1854_v15 = vld [vmem:[#allocation11 + $0x300] sm:$0xff] }
 0x207   :  { %2019 = vmatpush2.msra.mxu0 %v1932_v16  ;;  %2090 = vmatpush2.msra.mxu1 %v1934_v17  ;;  %v1856_v16 = vld [vmem:[#allocation11 + $0x310] sm:$0xff]  ;;  %v2967_v17 = vmax.f32 %v355_v11, 0.0 }
 0x208   :  { %2020 = vmatprep.subr.mxu0 %v1927_v18  ;;  %2091 = vmatprep.subr.mxu1 %v1929_v19  ;;  %v1853_v18 = vld [vmem:[#allocation11 + $0x2f8] sm:$0xff]  ;;  %v1847_v19 = vld [vmem:[#allocation11 + $0x2c8] sm:$0xff] }
 0x209   :  { %2021 = vmatpush2.msra.mxu0 %v1926_v20  ;;  %2092 = vmatpush2.msra.mxu1 %v1928_v21  ;;  %v1846_v20 = vld [vmem:[#allocation11 + $0x2c0] sm:$0xff]  ;;  %v1841_v21 = vld [vmem:[#allocation11 + $0x298] sm:$0xff] }
 0x20a   :  { %2022 = vmatprep.subr.mxu0 %v1921_v25  ;;  %2093 = vmatprep.subr.mxu1 %v1923_v27  ;;  %v1840_v25 = vld [vmem:[#allocation11 + $0x290] sm:$0xff]  ;;  %v1835_v27 = vld [vmem:[#allocation11 + $0x268] sm:$0xff] }
 0x20b   :  { %2023 = vmatpush2.msra.mxu0 %v1920_v28  ;;  %2094 = vmatpush2.msra.mxu1 %v1922_v29  ;;  %v1834_v28 = vld [vmem:[#allocation11 + $0x260] sm:$0xff]  ;;  %v1829_v29 = vld [vmem:[#allocation11 + $0x238] sm:$0xff] }
 0x20c   :  { %2024 = vmatprep.subr.mxu0 %v1915_v30  ;;  %2095 = vmatprep.subr.mxu1 %v1917_v31  ;;  %v1828_v30 = vld [vmem:[#allocation11 + $0x230] sm:$0xff]  ;;  %v1823_v31 = vld [vmem:[#allocation11 + $0x208] sm:$0xff] }
 0x20d   :  { %2025 = vmatpush2.msra.mxu0 %v1914_v32  ;;  %2096 = vmatpush2.msra.mxu1 %v1916_v35  ;;  %v1822_v32 = vld [vmem:[#allocation11 + $0x200] sm:$0xff]  ;;  %v1817_v35 = vld [vmem:[#allocation11 + $0x1d8] sm:$0xff] }
 0x20e   :  { %2026 = vmatprep.subr.mxu0 %v1909_v36  ;;  %2097 = vmatprep.subr.mxu1 %v1911_v37  ;;  %v1811_v36 = vld [vmem:[#allocation11 + $0x1a8] sm:$0xff]  ;;  %v1810_v37 = vld [vmem:[#allocation11 + $0x1a0] sm:$0xff]  ;;  %v2972_v11 = vld [vmem:[#allocation10] sm:$0xff] }
 0x20f   :  { %2027 = vmatpush2.msra.mxu0 %v1908_v38  ;;  %2098 = vmatpush2.msra.mxu1 %v1910_v39  ;;  %v1805_v38 = vld [vmem:[#allocation11 + $0x178] sm:$0xff]  ;;  %v1804_v39 = vld [vmem:[#allocation11 + $0x170] sm:$0xff] }
 0x210   :  { %2028 = vmatprep.subr.mxu0 %v1903_v40  ;;  %2099 = vmatprep.subr.mxu1 %v1905_v41  ;;  %v1799_v40 = vld [vmem:[#allocation11 + $0x148] sm:$0xff]  ;;  %v1798_v41 = vld [vmem:[#allocation11 + $0x140] sm:$0xff] }
 0x211   :  { %2029 = vmatpush2.msra.mxu0 %v1902_v42  ;;  %2100 = vmatpush2.msra.mxu1 %v1904_v43  ;;  %v1793_v42 = vld [vmem:[#allocation11 + $0x118] sm:$0xff]  ;;  %v1792_v43 = vld [vmem:[#allocation11 + $0x110] sm:$0xff] }
 0x212   :  { %2030 = vmatprep.subr.mxu0 %v1897_v44  ;;  %2101 = vmatprep.subr.mxu1 %v1899_v45  ;;  %v1787_v44 = vld [vmem:[#allocation11 + $0xe8] sm:$0xff]  ;;  %v1786_v45 = vld [vmem:[#allocation11 + $0xe0] sm:$0xff] }
 0x213   :  { %2031 = vmatpush2.msra.mxu0 %v1896_v47  ;;  %2102 = vmatpush2.msra.mxu1 %v1898_v48  ;;  %v1781_v47 = vld [vmem:[#allocation11 + $0xb8] sm:$0xff]  ;;  %v1780_v48 = vld [vmem:[#allocation11 + $0xb0] sm:$0xff] }
 0x214   :  { %2032 = vmatprep.subr.mxu0 %v1891_v50  ;;  %2103 = vmatprep.subr.mxu1 %v1893_v51  ;;  %v1775_v50 = vld [vmem:[#allocation11 + $0x88] sm:$0xff]  ;;  %v1774_v51 = vld [vmem:[#allocation11 + $0x80] sm:$0xff] }
 0x215   :  { %2033 = vmatpush2.msra.mxu0 %v1890_v52  ;;  %2104 = vmatpush2.msra.mxu1 %v1892_v53  ;;  %v1769_v52 = vld [vmem:[#allocation11 + $0x58] sm:$0xff]  ;;  %v1768_v53 = vld [vmem:[#allocation11 + $0x50] sm:$0xff] }
 0x216   :  { %2034 = vmatprep.subr.mxu0 %v1885_v54  ;;  %2105 = vmatprep.subr.mxu1 %v1887_v55  ;;  %v1763_v54 = vld [vmem:[#allocation11 + $0x28] sm:$0xff]  ;;  %v1762_v55 = vld [vmem:[#allocation11 + $0x20] sm:$0xff] }
 0x217   :  { %2035 = vmatpush2.msra.mxu0 %v1884_v58  ;;  %2106 = vmatpush2.msra.mxu1 %v1886_v59  ;;  %v1949_v58 = vld [vmem:[#allocation11 + $0x5f8] sm:$0xff]  ;;  %v1948_v59 = vld [vmem:[#allocation11 + $0x5f0] sm:$0xff] }
 0x218   :  { %2036 = vmatprep.subr.mxu0 %v1879_v60  ;;  %2107 = vmatprep.subr.mxu1 %v1881_v61  ;;  %v1943_v60 = vld [vmem:[#allocation11 + $0x5c8] sm:$0xff]  ;;  %v1942_v61 = vld [vmem:[#allocation11 + $0x5c0] sm:$0xff] }
 0x219   :  { %2037 = vmatpush2.msra.mxu0 %v1878_v62  ;;  %2108 = vmatpush2.msra.mxu1 %v1880_v63  ;;  %v1937_v62 = vld [vmem:[#allocation11 + $0x598] sm:$0xff]  ;;  %v1936_v63 = vld [vmem:[#allocation11 + $0x590] sm:$0xff] }
 0x21a   :  { %2038 = vmatprep.subr.mxu0 %v1873_v1  ;;  %2109 = vmatprep.subr.mxu1 %v1875_v33  ;;  %v1931_v1 = vld [vmem:[#allocation11 + $0x568] sm:$0xff]  ;;  %v1930_v33 = vld [vmem:[#allocation11 + $0x560] sm:$0xff] }
 0x21b   :  { %2039 = vmatpush2.msra.mxu0 %v1872_v3  ;;  %2110 = vmatpush2.msra.mxu1 %v1874_v4  ;;  %v1924_v3 = vld [vmem:[#allocation11 + $0x530] sm:$0xff]  ;;  %v1919_v4 = vld [vmem:[#allocation11 + $0x508] sm:$0xff] }
 0x21c   :  { %2040 = vmatprep.subr.mxu0 %v1867_v5  ;;  %2111 = vmatprep.subr.mxu1 %v1869_v6  ;;  %v1918_v5 = vld [vmem:[#allocation11 + $0x500] sm:$0xff]  ;;  %v1913_v6 = vld [vmem:[#allocation11 + $0x4d8] sm:$0xff] }
 0x21d   :  { %2041 = vmatpush2.msra.mxu0 %v1866_v7  ;;  %2112 = vmatpush2.msra.mxu1 %v1868_v8  ;;  %v877_v7 = vpop.f32.mrf.mxu0  ;;  %v948_v8 = vpop.f32.mrf.mxu1 }
 0x21e   :  { %2042 = vmatprep.subr.mxu0 %v1861_v34  ;;  %2113 = vmatprep.subr.mxu1 %v1863_v10  ;;  %v1912_v34 = vld [vmem:[#allocation11 + $0x4d0] sm:$0xff]  ;;  %v1907_v10 = vld [vmem:[#allocation11 + $0x4a8] sm:$0xff] }
 0x21f   :  { %2043 = vmatpush2.msra.mxu0 %v1860_v56  ;;  %2114 = vmatpush2.msra.mxu1 %v1862_v12  ;;  %v1906_v56 = vld [vmem:[#allocation11 + $0x4a0] sm:$0xff]  ;;  %v758_v12 = vrot.slane %v2972_v11, %v2928_v26 }
 0x220   :  { %2044 = vmatprep.subr.mxu0 %v1855_v13  ;;  %2115 = vmatprep.subr.mxu1 %v1857_v14  ;;  %v766_v13 = vrot.slane %v2972_v11, %v2949_v46  ;;  %v1901_v14 = vld [vmem:[#allocation11 + $0x478] sm:$0xff] }
 0x221   :  { %2045 = vmatpush2.msra.mxu0 %v1854_v15  ;;  %2116 = vmatpush2.msra.mxu1 %v1856_v16  ;;  %v879_v15 = vpop.f32.mrf.mxu0  ;;  %v950_v16 = vpop.f32.mrf.mxu1 }
 0x222   :  { %2047 = vmatmul.mubr.f32.vlgmr.msra.gmra.mxu0 %v2967_v17  ;;  %2118 = vmatmul.mubr.f32.vlgmr.msra.gmra.mxu1 %v2967_v17 }
 0x223   :  { %2124 = vmatprep.subr.mxu0 %v1853_v18  ;;  %2188 = vmatprep.mubr.f32.mxu0 %v2957_v9  ;;  %v1816_v9 = vld [vmem:[#allocation11 + $0x1d0] sm:$0xff] }
 0x224   :  { %2125 = vmatpush1.msra.mxu0 %v1852_v49  ;;  %v1900_v18 = vld [vmem:[#allocation11 + $0x470] sm:$0xff]  ;;  %v754_v49 = vrot.slane %v2972_v11, %v2925_v24 }
 0x225   :  { %2126 = vmatprep.subr.mxu0 %v1847_v19  ;;  %v762_v19 = vrot.slane %v2972_v11, %v2962_v57 }
 0x226   :  { %2127 = vmatpush1.msra.mxu0 %v1846_v20  ;;  %v1895_v20 = vld [vmem:[#allocation11 + $0x448] sm:$0xff] }
 0x227   :  { %2128 = vmatprep.subr.mxu0 %v1841_v21  ;;  %v1894_v21 = vld [vmem:[#allocation11 + $0x440] sm:$0xff] }
 0x228   :  { %2129 = vmatpush1.msra.mxu0 %v1840_v25  ;;  %v880_v25 = vadd.f32 %v879_v15, %v758_v12 }
 0x229   :  { %2130 = vmatprep.subr.mxu0 %v1835_v27  ;;  %v951_v27 = vadd.f32 %v950_v16, %v766_v13 }
 0x22a   :  { %2131 = vmatpush1.msra.mxu0 %v1834_v28  ;;  %v1889_v28 = vld [vmem:[#allocation11 + $0x418] sm:$0xff] }
 0x22b   :  { %2132 = vmatprep.subr.mxu0 %v1829_v29  ;;  %v1888_v29 = vld [vmem:[#allocation11 + $0x410] sm:$0xff] }
 0x22c   :  { %2133 = vmatpush1.msra.mxu0 %v1828_v30  ;;  %v878_v30 = vadd.f32 %v877_v7, %v754_v49 }
 0x22d   :  { %2134 = vmatprep.subr.mxu0 %v1823_v31  ;;  %v2982_v31 = vld [vmem:[#allocation14] sm:$0xff] }
 0x22e   :  { %2135 = vmatpush1.msra.mxu0 %v1822_v32  ;;  %v949_v32 = vadd.f32 %v948_v8, %v762_v19  ;;  %v1858_v8 = vld [vmem:[#allocation11 + $0x320] sm:$0xff] }
 0x22f   :  { %2136 = vmatprep.subr.mxu0 %v1817_v35  ;;  %v1883_v35 = vld [vmem:[#allocation11 + $0x3e8] sm:$0xff] }
 0x230   :  { %2137 = vmatpush1.msra.mxu0 %v1816_v9  ;;  %v1882_v9 = vld [vmem:[#allocation11 + $0x3e0] sm:$0xff] }
 0x231   :  { %2138 = vmatprep.subr.mxu0 %v1811_v36  ;;  %v2985_v36 = vsub.s32 4, %v2922_v23 }
 0x232   :  { %2139 = vmatpush1.msra.mxu0 %v1810_v37  ;;  %v777_v37 = vsub.s32 6, %v2922_v23 }
 0x233   :  { %2140 = vmatprep.subr.mxu0 %v1805_v38  ;;  %v1238_v38 = vmax.f32 %v880_v25, 0.0 }
 0x234   :  { %2141 = vmatpush1.msra.mxu0 %v1804_v39  ;;  %v1260_v39 = vrot.slane %v2982_v31, %v2928_v26  ;;  %v1280_v12 = vrot.slane %v2982_v31, %v777_v37 }
 0x235   :  { %2142 = vmatprep.subr.mxu0 %v1799_v40  ;;  %v1240_v40 = vmax.f32 %v951_v27, 0.0 }
 0x236   :  { %2143 = vmatpush1.msra.mxu0 %v1798_v41  ;;  %v1268_v41 = vrot.slane %v2982_v31, %v2949_v46 }
 0x237   :  { %2144 = vmatprep.subr.mxu0 %v1793_v42  ;;  %v1877_v42 = vld [vmem:[#allocation11 + $0x3b8] sm:$0xff] }
 0x238   :  { %2145 = vmatpush1.msra.mxu0 %v1792_v43  ;;  %v1256_v43 = vrot.slane %v2982_v31, %v2925_v24 }
 0x239   :  { %2146 = vmatprep.subr.mxu0 %v1787_v44  ;;  %v1876_v44 = vld [vmem:[#allocation11 + $0x3b0] sm:$0xff] }
 0x23a   :  { %2147 = vmatpush1.msra.mxu0 %v1786_v45  ;;  %v2995_v45 = vsub.s32 5, %v2922_v23 }
 0x23b   :  { %2148 = vmatprep.subr.mxu0 %v1781_v47  ;;  %v781_v47 = vsub.s32 7, %v2922_v23 }
 0x23c   :  { %2149 = vmatpush1.msra.mxu0 %v1780_v48  ;;  %v1237_v48 = vmax.f32 %v878_v30, 0.0 }
 0x23d   :  { %2150 = vmatprep.subr.mxu0 %v1775_v50  ;;  %v1239_v50 = vmax.f32 %v949_v32, 0.0  ;;  %v1284_v16 = vrot.slane %v2982_v31, %v781_v47 }
 0x23e   :  { %2151 = vmatpush1.msra.mxu0 %v1774_v51  ;;  %v1264_v51 = vrot.slane %v2982_v31, %v2962_v57 }
 0x23f   :  { %2152 = vmatprep.subr.mxu0 %v1769_v52  ;;  %v2816_v52 = vmov 1983009808  }
 0x240   :  { %2153 = vmatpush1.msra.mxu0 %v1768_v53  ;;  %v1328_v53 = vunpack.c.l.s4 %v2816_v52 }
 0x241   :  { %2154 = vmatprep.subr.mxu0 %v1763_v54  ;;  %v1871_v54 = vld [vmem:[#allocation11 + $0x388] sm:$0xff] }
 0x242   :  { %2155 = vmatpush1.msra.mxu0 %v1762_v55  ;;  %v1870_v55 = vld [vmem:[#allocation11 + $0x380] sm:$0xff] }
 0x243   :  { %2156 = vmatprep.subr.mxu0 %v1949_v58  ;;  %v770_v58 = vrot.slane %v2972_v11, %v2985_v36 }
 0x244   :  { %2157 = vmatpush2.msra.mxu0 %v1948_v59  ;;  %v778_v59 = vrot.slane %v2972_v11, %v777_v37 }
 0x245   :  { %2158 = vmatprep.subr.mxu0 %v1943_v60  ;;  %v3003_v60 = vmul.f32 %v1260_v39, %v1238_v38 }
 0x246   :  { %2159 = vmatpush2.msra.mxu0 %v1942_v61  ;;  %v3005_v61 = vmul.f32 %v1268_v41, %v1240_v40 }
 0x247   :  { %2160 = vmatprep.subr.mxu0 %v1937_v62  ;;  %v1865_v62 = vld [vmem:[#allocation11 + $0x358] sm:$0xff] }
 0x248   :  { %2161 = vmatpush2.msra.mxu0 %v1936_v63  ;;  %v1864_v63 = vld [vmem:[#allocation11 + $0x350] sm:$0xff] }
 0x249   :  { %2162 = vmatprep.subr.mxu0 %v1931_v1  ;;  %v774_v1 = vrot.slane %v2972_v11, %v2995_v45 }
 0x24a   :  { %2163 = vmatpush2.msra.mxu0 %v1930_v33  ;;  %v782_v33 = vrot.slane %v2972_v11, %v781_v47  ;;  %v1341_v11 = vcombine.low %v3003_v60, %v3005_v61 }
 0x24b   :  { %2164 = vmatprep.subr.mxu0 %v1925_v2  ;;  %v3010_v2 = vmul.f32 %v1256_v43, %v1237_v48 }
 0x24c   :  { %2165 = vmatpush2.msra.mxu0 %v1924_v3  ;;  %v3012_v3 = vmul.f32 %v1264_v51, %v1239_v50  ;;  %v1342_v51 = vcombine.high %v3003_v60, %v3005_v61 }
 0x24d   :  { %2166 = vmatprep.subr.mxu0 %v1919_v4  ;;  %v1329_v4 = vunpack.c.0.s8 %v1328_v53 }
 0x24e   :  { %2167 = vmatpush2.msra.mxu0 %v1918_v5  ;;  %v1859_v5 = vld [vmem:[#allocation11 + $0x328] sm:$0xff]  ;;  %v1325_v27 = vcombine.low %v3010_v2, %v3012_v3 }
 0x24f   :  { %2168 = vmatprep.subr.mxu0 %v1913_v6 }
 0x250   :  { %2169 = vmatpush2.msra.mxu0 %v1912_v34 }
 0x251   :  { %2170 = vmatprep.subr.mxu0 %v1907_v10  ;;  %v1272_v10 = vrot.slane %v2982_v31, %v2985_v36 }
 0x252   :  { %2171 = vmatpush2.msra.mxu0 %v1906_v56 }
 0x253   :  { %2172 = vmatprep.subr.mxu0 %v1901_v14  ;;  %v1276_v14 = vrot.slane %v2982_v31, %v2995_v45 }
 0x254   :  { %2173 = vmatpush2.msra.mxu0 %v1900_v18  ;;  %v2817_v18 = vmov 1934713408  }
 0x255   :  { %2174 = vmatprep.subr.mxu0 %v1895_v20  ;;  %v1392_v49 = vunpack.c.l.s4 %v2817_v18 }
 0x256   :  { %2175 = vmatpush2.msra.mxu0 %v1894_v21 }
 0x257   :  { %2176 = vmatprep.subr.mxu0 %v1889_v28  ;;  %v3025_v28 = vsub.s32 %v1329_v4, %v2922_v23 }
 0x258   :  { %2177 = vmatpush2.msra.mxu0 %v1888_v29 }
 0x259   :  { %2178 = vmatprep.subr.mxu0 %v1883_v35  ;;  %v1393_v35 = vunpack.c.0.s8 %v1392_v49  ;;  %v1349_v39 = vrot.slane %v1341_v11, %v3025_v28  ;;  %v1333_v41 = vrot.slane %v1325_v27, %v3025_v28 }
 0x25a   :  { %2179 = vmatpush2.msra.mxu0 %v1882_v9 }
 0x25b   :  { %2180 = vmatprep.subr.mxu0 %v1877_v42  ;;  %v3033_v47 = vsub.s32 %v1393_v35, %v2922_v23 }
 0x25c   :  { %2181 = vmatpush2.msra.mxu0 %v1876_v44  ;;  %v1389_v44 = vcombine.low %v1333_v41, %v1349_v39 }
 0x25d   :  { %2182 = vmatprep.subr.mxu0 %v1871_v54 }
 0x25e   :  { %2183 = vmatpush2.msra.mxu0 %v1870_v55  ;;  %v1019_v6 = vpop.f32.mrf.mxu0  ;;  %v1090_v7 = vpop.f32.mrf.mxu1  ;;  %v1397_v53 = vrot.slane %v1389_v44, %v3033_v47  ;;  %v1390_v55 = vcombine.high %v1333_v41, %v1349_v39 }
 0x25f   :  { %2184 = vmatprep.subr.mxu0 %v1865_v62  ;;  %v1020_v34 = vadd.f32 %v1019_v6, %v770_v58  ;;  %v1091_v56 = vadd.f32 %v1090_v7, %v778_v59  ;;  %v1326_v58 = vcombine.high %v3010_v2, %v3012_v3 }
 0x260   :  { %2185 = vmatpush2.msra.mxu0 %v1864_v63  ;;  %v1021_v13 = vpop.f32.mrf.mxu0  ;;  %v1092_v15 = vpop.f32.mrf.mxu1  ;;  %v1404_v60 = vrot.slane %v1390_v55, %v3033_v47 }
 0x261   :  { %2186 = vmatprep.subr.mxu0 %v1859_v5  ;;  %v1241_v19 = vmax.f32 %v1020_v34, 0.0  ;;  %v1243_v20 = vmax.f32 %v1091_v56, 0.0  ;;  %v1022_v21 = vadd.f32 %v1021_v13, %v774_v1  ;;  %v1093_v25 = vadd.f32 %v1092_v15, %v782_v33 }
 0x262   :  { %2187 = vmatpush2.msra.mxu0 %v1858_v8  ;;  %v1356_v33 = vrot.slane %v1342_v51, %v3025_v28  ;;  %v1340_v61 = vrot.slane %v1326_v58, %v3025_v28 }
 0x263   :  { %v1317_v29 = vmul.f32 %v1272_v10, %v1241_v19  ;;  %v1319_v30 = vmul.f32 %v1280_v12, %v1243_v20  ;;  %2189 = vmatmul.mubr.f32.vlgmr.msra.gmra.mxu0 %v2967_v17  ;;  %v1242_v32 = vmax.f32 %v1022_v21, 0.0  ;;  %v1244_v31 = vmax.f32 %v1093_v25, 0.0  ;;  %v1250_v19 = vld [vmem:[#allocation14 + $0x8] sm:$0xf] }
 0x264   :  { %v1405_v2 = vcombine.low %v1340_v61, %v1356_v33  ;;  %v1406_v56 = vcombine.high %v1340_v61, %v1356_v33 }
 0x265   :  { %v1357_v9 = vcombine.low %v1317_v29, %v1319_v30  ;;  %v1318_v37 = vmul.f32 %v1276_v14, %v1242_v32  ;;  %v1320_v38 = vmul.f32 %v1284_v16, %v1244_v31  ;;  %v1358_v52 = vcombine.high %v1317_v29, %v1319_v30  ;;  %v748_v16 = vld [vmem:[#allocation10 + $0x8] sm:$0xf] }
 0x266   :  { %v1413_v8 = vrot.slane %v1405_v2, %v3033_v47  ;;  %v1420_v13 = vrot.slane %v1406_v56, %v3033_v47  ;;  %v786_v18 = vrot.slane %v748_v16, %v2925_v24  ;;  %v794_v49 = vrot.slane %v748_v16, %v2962_v57 }
 0x267   :  { %v1373_v40 = vcombine.low %v1318_v37, %v1320_v38  ;;  %v1365_v42 = vrot.slane %v1357_v9, %v3025_v28  ;;  %v1374_v17 = vcombine.high %v1318_v37, %v1320_v38  ;;  %v1372_v4 = vrot.slane %v1358_v52, %v3025_v28 }
 0x268   :  { %v790_v20 = vrot.slane %v748_v16, %v2928_v26  ;;  %v798_v21 = vrot.slane %v748_v16, %v2949_v46  ;;  %v1288_v30 = vrot.slane %v1250_v19, %v2925_v24  ;;  %v1296_v31 = vrot.slane %v1250_v19, %v2962_v57  ;;  %v3078_v16 = vld [vmem:[#allocation17] ss:$0 sm:$0xff] }
 0x269   :  { %v1381_v43 = vrot.slane %v1373_v40, %v3025_v28  ;;  %v1388_v59 = vrot.slane %v1374_v17, %v3025_v28  ;;  %v1292_v9 = vrot.slane %v1250_v19, %v2928_v26  ;;  %v1300_v38 = vrot.slane %v1250_v19, %v2949_v46 }
 0x26b   :  { %v1421_v48 = vcombine.low %v1365_v42, %v1381_v43  ;;  %v1422_v50 = vcombine.high %v1365_v42, %v1381_v43  ;;  %v1437_v6 = vcombine.low %v1372_v4, %v1388_v59  ;;  %v1438_v10 = vcombine.high %v1372_v4, %v1388_v59 }
 0x26d   :  { %v1429_v54 = vrot.slane %v1421_v48, %v3033_v47  ;;  %v1436_v1 = vrot.slane %v1422_v50, %v3033_v47  ;;  %v1445_v7 = vrot.slane %v1437_v6, %v3033_v47  ;;  %v1452_v11 = vrot.slane %v1438_v10, %v3033_v47 }
 0x26f   :  { %v1454_v62 = vcombine.high %v1397_v53, %v1429_v54  ;;  %v1453_v63 = vcombine.low %v1397_v53, %v1429_v54  ;;  %v1455_v5 = vcombine.low %v1404_v60, %v1436_v1  ;;  %v1456_v3 = vcombine.high %v1404_v60, %v1436_v1 }
 0x270   :  { %v1457_v34 = vcombine.low %v1413_v8, %v1445_v7  ;;  %v1458_v12 = vcombine.high %v1413_v8, %v1445_v7  ;;  %v1459_v14 = vcombine.low %v1420_v13, %v1452_v11  ;;  %v1460_v15 = vcombine.high %v1420_v13, %v1452_v11 }
 0x271   :  { %1535 = vadd.xlane.f32.xlu1 %v1454_v62  ;;  %1529 = vadd.xlane.f32.xlu0 %v1453_v63 }
 0x275   :  { %1540 = vadd.xlane.f32.xlu0 %v1455_v5 }
 0x279   :  { %1545 = vadd.xlane.f32.xlu0 %v1456_v3 }
 0x27d   :  { %1550 = vadd.xlane.f32.xlu0 %v1457_v34 }
 0x281   :  { %1555 = vadd.xlane.f32.xlu0 %v1458_v12 }
 0x285   :  { %1560 = vadd.xlane.f32.xlu0 %v1459_v14 }
 0x289   :  { %1565 = vadd.xlane.f32.xlu0 %v1460_v15 }
 0x2a0   :  { %v1161_v25 = vpop.f32.mrf.mxu0  ;;  %v1232_v27 = vpop.f32.mrf.mxu1 }
 0x2a1   :  { %v1162_v29 = vadd.f32 %v1161_v25, %v786_v18  ;;  %v1233_v32 = vadd.f32 %v1232_v27, %v794_v49  ;;  %v2818_v49 = vmov 0  }
 0x2a2   :  { %v1163_v35 = vpop.f32.mrf.mxu0  ;;  %v1234_v37 = vpop.f32.mrf.mxu1  ;;  %2541 = vset.pattern.permute.xlu0 %v2818_v49  ;;  %2540 = vset.pattern.permute.xlu1 %v2818_v49 }
 0x2a3   :  { %v1245_v39 = vmax.f32 %v1162_v29, 0.0  ;;  %v1247_v40 = vmax.f32 %v1233_v32, 0.0  ;;  %v1164_v41 = vadd.f32 %v1163_v35, %v790_v20  ;;  %v1235_v42 = vadd.f32 %v1234_v37, %v798_v21  ;;  %v1950_v21 = vld [vmem:[#allocation13] sm:$0x3f] }
 0x2a4   :  { %v1959_v25 = vrot.slane %v1950_v21, %v2928_v26  ;;  %v1967_v27 = vrot.slane %v1950_v21, %v2949_v46  ;;  %v1955_v32 = vrot.slane %v1950_v21, %v2925_v24 }
 0x2a5   :  { %v1321_v43 = vmul.f32 %v1288_v30, %v1245_v39  ;;  %v1323_v44 = vmul.f32 %v1296_v31, %v1247_v40  ;;  %v1246_v17 = vmax.f32 %v1164_v41, 0.0  ;;  %v1248_v48 = vmax.f32 %v1235_v42, 0.0  ;;  %v2201_v40 = vld [vmem:[#allocation16] sm:$0x3f] }
 0x2a6   :  { %v1963_v31 = vrot.slane %v1950_v21, %v2962_v57  ;;  %v2210_v42 = vrot.slane %v2201_v40, %v2928_v26 }
 0x2a7   :  { %v1461_v50 = vcombine.low %v1321_v43, %v1323_v44  ;;  %v1462_v51 = vcombine.high %v1321_v43, %v1323_v44  ;;  %v1322_v52 = vmul.f32 %v1292_v9, %v1246_v17  ;;  %v1324_v53 = vmul.f32 %v1300_v38, %v1248_v48 }
 0x2a8   :  { %v2218_v44 = vrot.slane %v2201_v40, %v2949_v46  ;;  %v2206_v48 = vrot.slane %v2201_v40, %v2925_v24  ;;  %v2222_v46 = vrot.slane %v2201_v40, %v2985_v36  ;;  %v2226_v24 = vrot.slane %v2201_v40, %v2995_v45 }
 0x2a9   :  { %v1477_v54 = vcombine.low %v1322_v52, %v1324_v53  ;;  %v1478_v55 = vcombine.high %v1322_v52, %v1324_v53  ;;  %v1469_v58 = vrot.slane %v1461_v50, %v3025_v28  ;;  %v1476_v62 = vrot.slane %v1462_v51, %v3025_v28 }
 0x2aa   :  { %v2214_v51 = vrot.slane %v2201_v40, %v2962_v57 }
 0x2ab   :  { %v1485_v59 = vrot.slane %v1477_v54, %v3025_v28  ;;  %v1492_v63 = vrot.slane %v1478_v55, %v3025_v28  ;;  %v1971_v55 = vrot.slane %v1950_v21, %v2985_v36 }
 0x2ad   :  { %v1494_v1 = vcombine.high %v1469_v58, %v1485_v59  ;;  %v1493_v33 = vcombine.low %v1469_v58, %v1485_v59  ;;  %v1509_v4 = vcombine.low %v1476_v62, %v1492_v63  ;;  %v1510_v3 = vcombine.high %v1476_v62, %v1492_v63 }
 0x2ae   :  { %v1975_v62 = vrot.slane %v1950_v21, %v2995_v45 }
 0x2af   :  { %v1508_v60 = vrot.slane %v1494_v1, %v3033_v47  ;;  %v1501_v61 = vrot.slane %v1493_v33, %v3033_v47  ;;  %v1517_v2 = vrot.slane %v1509_v4, %v3033_v47  ;;  %v1524_v8 = vrot.slane %v1510_v3, %v3033_v47 }
 0x2b1   :  { %v1542_v5 = vsel %vm1531_vm1, %v1508_v60, 0.0  ;;  %v1532_v6 = vsel %vm1531_vm1, %v1501_v61, 0.0  ;;  %v1552_v7 = vsel %vm1531_vm1, %v1517_v2, 0.0  ;;  %v1562_v34 = vsel %vm1531_vm1, %v1524_v8, 0.0 }
 0x2b2   :  { %1543 = vadd.xlane.f32.xlu1 %v1542_v5  ;;  %1533 = vadd.xlane.f32.xlu0 %v1532_v6  ;;  %v1525_v10 = vcombine.high %v1501_v61, %v2815_v0  ;;  %v1526_v12 = vcombine.high %v1508_v60, %v2815_v0  ;;  %v1527_v13 = vcombine.high %v1517_v2, %v2815_v0 }
 0x2b3   :  { %v1528_v15 = vcombine.high %v1524_v8, %v2815_v0 }
 0x2b4   :  { %v1537_v56 = vsel %vm1531_vm1, %v1525_v10, 0.0  ;;  %v1547_v11 = vsel %vm1531_vm1, %v1526_v12, 0.0  ;;  %v1557_v14 = vsel %vm1531_vm1, %v1527_v13, 0.0 }
 0x2b5   :  { %v1567_v18 = vsel %vm1531_vm1, %v1528_v15, 0.0 }
 0x2b6   :  { %1553 = vadd.xlane.f32.xlu1 %v1552_v7 }
 0x2ba   :  { %1563 = vadd.xlane.f32.xlu1 %v1562_v34 }
 0x2be   :  { %1538 = vadd.xlane.f32.xlu1 %v1537_v56 }
 0x2c2   :  { %1548 = vadd.xlane.f32.xlu1 %v1547_v11 }
 0x2c6   :  { %1558 = vadd.xlane.f32.xlu1 %v1557_v14 }
 0x2c8   :  { %1577 = vbcast.lane.b32.xlu0 %v3078_v16, 256 }
 0x2ca   :  { %1568 = vadd.xlane.f32.xlu1 %v1567_v18 }
 0x2e2   :  { %v2048_v19 = vpop.f32.mrf.mxu0  ;;  %v2119_v20 = vpop.f32.mrf.mxu1 }
 0x2e3   :  { %v2049_v37 = vadd.f32 %v2048_v19, %v1955_v32  ;;  %v2120_v38 = vadd.f32 %v2119_v20, %v1963_v31 }
 0x2e4   :  { %v2050_v29 = vpop.f32.mrf.mxu0  ;;  %v2121_v30 = vpop.f32.mrf.mxu1 }
 0x2e5   :  { %v2051_v35 = vadd.f32 %v2050_v29, %v1959_v25  ;;  %v2122_v9 = vadd.f32 %v2121_v30, %v1967_v27  ;;  %v2195_v17 = vmax.f32 %v2049_v37, 0.0  ;;  %v2197_v50 = vmax.f32 %v2120_v38, 0.0 }
 0x2e7   :  { %v2196_v41 = vmax.f32 %v2051_v35, 0.0  ;;  %v2198_v43 = vmax.f32 %v2122_v9, 0.0  ;;  %v2233_v58 = vmul.f32 %v2206_v48, %v2195_v17  ;;  %v2235_v59 = vmul.f32 %v2214_v51, %v2197_v50 }
 0x2e9   :  { %v2234_v52 = vmul.f32 %v2210_v42, %v2196_v41  ;;  %v2236_v53 = vmul.f32 %v2218_v44, %v2198_v43  ;;  %v2239_v4 = vcombine.low %v2233_v58, %v2235_v59  ;;  %v2240_v6 = vcombine.high %v2233_v58, %v2235_v59 }
 0x2eb   :  { %v2255_v63 = vcombine.low %v2234_v52, %v2236_v53  ;;  %v2256_v57 = vcombine.high %v2234_v52, %v2236_v53  ;;  %v2247_v8 = vrot.slane %v2239_v4, %v3025_v28  ;;  %v2254_v45 = vrot.slane %v2240_v6, %v3025_v28 }
 0x2ed   :  { %v2263_v2 = vrot.slane %v2255_v63, %v3025_v28  ;;  %v2270_v34 = vrot.slane %v2256_v57, %v3025_v28 }
 0x2ef   :  { %v2301_v14 = vcombine.low %v2247_v8, %v2263_v2  ;;  %v2318_v19 = vcombine.high %v2254_v45, %v2270_v34  ;;  %v2302_v31 = vcombine.high %v2247_v8, %v2263_v2  ;;  %v2317_v50 = vcombine.low %v2254_v45, %v2270_v34 }
 0x2f1   :  { %v2309_v20 = vrot.slane %v2301_v14, %v3033_v47  ;;  %v2316_v41 = vrot.slane %v2302_v31, %v3033_v47  ;;  %v2325_v58 = vrot.slane %v2317_v50, %v3033_v47 }
 0x2fa   :  { %v3086_v39 = vpop.xlane.xlu0 %1529 }
 0x2fe   :  { %v3092_v54 = vpop.xlane.xlu0 %1540 }
 0x302   :  { %v3098_v60 = vpop.xlane.xlu0 %1545 }
 0x306   :  { %v3105_v56 = vpop.xlane.xlu0 %1550 }
 0x30a   :  { %v1556_v29 = vpop.xlane.xlu0 %1555 }
 0x30e   :  { %v1561_v43 = vpop.xlane.xlu0 %1560 }
 0x323   :  { %v2190_v26 = vpop.f32.mrf.mxu0 }
 0x324   :  { %v2191_v1 = vadd.f32 %v2190_v26, %v1971_v55  ;;  %v1566_v55 = vpop.xlane.xlu0 %1565 }
 0x325   :  { %v2192_v33 = vpop.f32.mrf.mxu0 }
 0x326   :  { %v2199_v61 = vmax.f32 %v2191_v1, 0.0  ;;  %v2193_v5 = vadd.f32 %v2192_v33, %v1975_v62 }
 0x328   :  { %v2237_v3 = vmul.f32 %v2222_v46, %v2199_v61  ;;  %v2200_v7 = vmax.f32 %v2193_v5, 0.0  ;;  %v1536_v61 = vpop.xlane.xlu1 %1535 }
 0x32a   :  { %v2271_v36 = vcombine.high %v2237_v3, %v2815_v0  ;;  %v2238_v10 = vmul.f32 %v2226_v24, %v2200_v7  ;;  %v2278_v12 = vrot.slane %v2237_v3, %v3025_v28 }
 0x32c   :  { %v2286_v11 = vcombine.high %v2238_v10, %v2815_v0  ;;  %v2293_v13 = vrot.slane %v2238_v10, %v3025_v28  ;;  %v2285_v15 = vrot.slane %v2271_v36, %v3025_v28  ;;  %v2332_v0 = vrot.slane %v2318_v19, %v3033_v47 }
 0x32e   :  { %v2300_v18 = vrot.slane %v2286_v11, %v3025_v28  ;;  %v2333_v49 = vcombine.low %v2278_v12, %v2293_v13  ;;  %v2334_v27 = vcombine.high %v2278_v12, %v2293_v13 }
 0x330   :  { %v2341_v21 = vrot.slane %v2333_v49, %v3033_v47  ;;  %v2350_v25 = vcombine.high %v2285_v15, %v2300_v18  ;;  %v2348_v37 = vrot.slane %v2334_v27, %v3033_v47  ;;  %v2349_v48 = vcombine.low %v2285_v15, %v2300_v18 }
 0x332   :  { %v2365_v30 = vcombine.low %v2309_v20, %v2341_v21  ;;  %v2364_v32 = vrot.slane %v2350_v25, %v3033_v47  ;;  %v2366_v28 = vcombine.high %v2309_v20, %v2341_v21  ;;  %v2367_v17 = vcombine.low %v2316_v41, %v2348_v37 }
 0x333   :  { %v2368_v52 = vcombine.high %v2316_v41, %v2348_v37  ;;  %v2357_v53 = vrot.slane %v2349_v48, %v3033_v47  ;;  %v2516_v47 = vld [vmem:[#allocation19] ss:$0 sm:$0xff] }
 0x334   :  { %v2374_v35 = vsel %vm2373_vm2, %v2365_v30, 0.0  ;;  %v2371_v9 = vcombine.low %v2332_v0, %v2364_v32  ;;  %v2372_v38 = vcombine.high %v2332_v0, %v2364_v32  ;;  %v2377_v44 = vsel %vm2373_vm2, %v2366_v28, 0.0 }
 0x335   :  { %2375 = vadd.xlane.f32.xlu1 %v2374_v35  ;;  %v2380_v51 = vsel %vm2373_vm2, %v2367_v17, 0.0  ;;  %v2383_v59 = vsel %vm2373_vm2, %v2368_v52, 0.0  ;;  %v2369_v62 = vcombine.low %v2325_v58, %v2357_v53  ;;  %v2370_v1 = vcombine.high %v2325_v58, %v2357_v53 }
 0x336   :  { %v2392_v40 = vsel %vm2373_vm2, %v2371_v9, 0.0  ;;  %v2395_v42 = vsel %vm2373_vm2, %v2372_v38, 0.0 }
 0x337   :  { %2393 = vadd.xlane.f32.xlu0 %v2392_v40  ;;  %v2386_v63 = vsel %vm2373_vm2, %v2369_v62, 0.0  ;;  %v2389_v33 = vsel %vm2373_vm2, %v2370_v1, 0.0 }
 0x339   :  { %2378 = vadd.xlane.f32.xlu1 %v2377_v44 }
 0x33b   :  { %v1534_v26 = vpop.xlane.xlu0 %1533 }
 0x33d   :  { %2381 = vadd.xlane.f32.xlu1 %v2380_v51  ;;  %v1666_v51 = vand.u32 127, %v193_v22 }
 0x33f   :  { %v1578_v46 = vpop.permute.xlu0 %1577  ;;  %v1671_v52 = vadd.s32 4294967288, %v1666_v51 }
 0x340   :  { %v1595_v24 = vadd.f32 %v1578_v46, %v1556_v29  ;;  %v1599_v4 = vadd.f32 %v1578_v46, %v1566_v55  ;;  %v1585_v57 = vadd.f32 %v1578_v46, %v3086_v39  ;;  %v1587_v5 = vadd.f32 %v1578_v46, %v1536_v61 }
 0x341   :  { %2384 = vadd.xlane.f32.xlu1 %v2383_v59  ;;  %v1589_v6 = vadd.f32 %v1578_v46, %v3092_v54  ;;  %v1591_v2 = vadd.f32 %v1578_v46, %v3098_v60  ;;  %v1593_v3 = vadd.f32 %v1578_v46, %v3105_v56  ;;  %v1597_v7 = vadd.f32 %v1578_v46, %v1561_v43 }
 0x342   :  { %v1674_v58 = vsub.s32 %v1671_v52, %v2922_v23 }
 0x345   :  { %2387 = vadd.xlane.f32.xlu1 %v2386_v63 }
 0x349   :  { %2390 = vadd.xlane.f32.xlu1 %v2389_v33 }
 0x34d   :  { %1648 = vperm.xlu0 %2541, %v1595_v24  }
 0x351   :  { %1660 = vperm.xlu0 %2541, %v1599_v4  }
 0x35a   :  { %1581 = vbcast.lane.b32.xlu1 %v3078_v16, 264  ;;  %v1544_v16 = vpop.xlane.xlu1 %1543 }
 0x35e   :  { %2405 = vbcast.lane.b32.xlu1 %v2516_v47, 256  ;;  %v1554_v8 = vpop.xlane.xlu1 %1553 }
 0x362   :  { %1618 = vperm.xlu1 %2540, %v1585_v57   ;;  %v1564_v34 = vpop.xlane.xlu1 %1563 }
 0x366   :  { %1624 = vperm.xlu1 %2540, %v1587_v5   ;;  %v1539_v39 = vpop.xlane.xlu1 %1538 }
 0x36a   :  { %1630 = vperm.xlu1 %2540, %v1589_v6   ;;  %v1549_v36 = vpop.xlane.xlu1 %1548 }
 0x36e   :  { %1636 = vperm.xlu1 %2540, %v1591_v2   ;;  %v1559_v10 = vpop.xlane.xlu1 %1558 }
 0x372   :  { %1642 = vperm.xlu1 %2540, %v1593_v3   ;;  %v1569_v45 = vpop.xlane.xlu1 %1568 }
 0x376   :  { %1654 = vperm.xlu1 %2540, %v1597_v7  }
 0x39a   :  { %2396 = vadd.xlane.f32.xlu1 %v2395_v42 }
 0x3be   :  { %v2376_v12 = vpop.xlane.xlu1 %2375 }
 0x3c0   :  { %v2394_v28 = vpop.xlane.xlu0 %2393 }
 0x3c2   :  { %v2379_v11 = vpop.xlane.xlu1 %2378 }
 0x3c6   :  { %v2382_v54 = vpop.xlane.xlu1 %2381 }
 0x3c8   :  { %v1649_v50 = vpop.permute.xlu0 %1648 }
 0x3ca   :  { %v2385_v13 = vpop.xlane.xlu1 %2384 }
 0x3cc   :  { %v1661_v53 = vpop.permute.xlu0 %1660 }
 0x3ce   :  { %v2388_v14 = vpop.xlane.xlu1 %2387 }
 0x3d2   :  { %v2391_v60 = vpop.xlane.xlu1 %2390 }
 0x3d6   :  { %v1582_v15 = vpop.permute.xlu1 %1581 }
 0x3d7   :  { %v1586_v18 = vadd.f32 %v1582_v15, %v1534_v26  ;;  %v1590_v56 = vadd.f32 %v1582_v15, %v1544_v16  ;;  %v1598_v49 = vadd.f32 %v1582_v15, %v1564_v34  ;;  %v1594_v19 = vadd.f32 %v1582_v15, %v1554_v8 }
 0x3d8   :  { %v1588_v25 = vadd.f32 %v1582_v15, %v1539_v39  ;;  %v1592_v29 = vadd.f32 %v1582_v15, %v1549_v36  ;;  %v1596_v30 = vadd.f32 %v1582_v15, %v1559_v10  ;;  %v1600_v0 = vadd.f32 %v1582_v15, %v1569_v45 }
 0x3d9   :  { %1621 = vperm.xlu0 %2541, %v1586_v18   ;;  %1633 = vperm.xlu1 %2540, %v1590_v56   ;;  %v1669_v26 = vsub.s32 %v1666_v51, %v2922_v23 }
 0x3da   :  { %v2406_v20 = vpop.permute.xlu1 %2405 }
 0x3db   :  { %v2411_v21 = vadd.f32 %v2406_v20, %v2385_v13  ;;  %v2413_v27 = vadd.f32 %v2406_v20, %v2391_v60  ;;  %v2408_v32 = vadd.f32 %v2406_v20, %v2376_v12  ;;  %v2409_v31 = vadd.f32 %v2406_v20, %v2379_v11 }
 0x3dc   :  { %v2410_v35 = vadd.f32 %v2406_v20, %v2382_v54  ;;  %v2412_v9 = vadd.f32 %v2406_v20, %v2388_v14  ;;  %v2414_v37 = vadd.f32 %v2406_v20, %v2394_v28  ;;  %v1717_v11 = vrot.slane %v1649_v50, %v1669_v26 }
 0x3dd   :  { %1657 = vperm.xlu0 %2541, %v1598_v49   ;;  %1645 = vperm.xlu1 %2540, %v1594_v19   ;;  %v1735_v49 = vrot.slane %v1661_v53, %v1669_v26 }
 0x3de   :  { %v1619_v38 = vpop.permute.xlu1 %1618 }
 0x3df   :  { %v1670_v33 = vrot.slane %v1619_v38, %v1669_v26 }
 0x3e1   :  { %2434 = vperm.xlu0 %2541, %v2411_v21   ;;  %1627 = vperm.xlu1 %2540, %v1588_v25  }
 0x3e2   :  { %v1625_v40 = vpop.permute.xlu1 %1624 }
 0x3e3   :  { %v1681_v24 = vrot.slane %v1625_v40, %v1669_v26 }
 0x3e5   :  { %2440 = vperm.xlu0 %2541, %v2413_v27   ;;  %1639 = vperm.xlu1 %2540, %v1592_v29  }
 0x3e6   :  { %v1631_v41 = vpop.permute.xlu1 %1630 }
 0x3e7   :  { %v1690_v47 = vrot.slane %v1631_v41, %v1669_v26 }
 0x3e9   :  { %1651 = vperm.xlu1 %2540, %v1596_v30   ;;  %v2448_v30 = vadd.s32 4294967284, %v1666_v51 }
 0x3ea   :  { %v1637_v42 = vpop.permute.xlu1 %1636 }
 0x3eb   :  { %v1699_v3 = vrot.slane %v1637_v42, %v1669_v26 }
 0x3ed   :  { %1663 = vperm.xlu1 %2540, %v1600_v0  }
 0x3ee   :  { %v1643_v43 = vpop.permute.xlu1 %1642 }
 0x3ef   :  { %v1708_v34 = vrot.slane %v1643_v43, %v1669_v26 }
 0x3f1   :  { %2425 = vperm.xlu1 %2540, %v2408_v32   ;;  %v2451_v32 = vsub.s32 %v2448_v30, %v2922_v23 }
 0x3f2   :  { %v1655_v44 = vpop.permute.xlu1 %1654 }
 0x3f3   :  { %v1726_v14 = vrot.slane %v1655_v44, %v1669_v26 }
 0x3f5   :  { %2428 = vperm.xlu1 %2540, %v2409_v31  }
 0x3f9   :  { %2431 = vperm.xlu1 %2540, %v2410_v35  }
 0x3fd   :  { %2437 = vperm.xlu1 %2540, %v2412_v9  }
 0x401   :  { %2443 = vperm.xlu1 %2540, %v2414_v37  }
 0x423   :  { %v2397_v17 = vpop.xlane.xlu1 %2396 }
 0x424   :  { %v2415_v48 = vadd.f32 %v2406_v20, %v2397_v17 }
 0x426   :  { %2446 = vperm.xlu0 %2541, %v2415_v48  }
 0x454   :  { %v1634_v55 = vpop.permute.xlu1 %1633  ;;  %v1622_v59 = vpop.permute.xlu0 %1621 }
 0x455   :  { %v1675_v63 = vrot.slane %v1622_v59, %v1674_v58  ;;  %v1694_v1 = vrot.slane %v1634_v55, %v1674_v58 }
 0x457   :  { %v1677_v22 = vsel %vm1676_vm3, %v1675_v63, %v1670_v33  ;;  %v1695_v61 = vsel %vm1676_vm3, %v1694_v1, %v1690_v47 }
 0x458   :  { %v1646_v62 = vpop.permute.xlu1 %1645  ;;  %v1658_v7 = vpop.permute.xlu0 %1657 }
 0x459   :  { %v1712_v5 = vrot.slane %v1646_v62, %v1674_v58  ;;  %v1730_v10 = vrot.slane %v1658_v7, %v1674_v58 }
 0x45b   :  { %v1713_v36 = vsel %vm1676_vm3, %v1712_v5, %v1708_v34  ;;  %v1731_v15 = vsel %vm1676_vm3, %v1730_v10, %v1726_v14 }
 0x45c   :  { %v1628_v46 = vpop.permute.xlu1 %1627  ;;  %v2435_v9 = vpop.permute.xlu0 %2434 }
 0x45d   :  { %v1685_v4 = vrot.slane %v1628_v46, %v1674_v58  ;;  %v2464_v42 = vrot.slane %v2435_v9, %v2451_v32 }
 0x45f   :  { %v1686_v57 = vsel %vm1676_vm3, %v1685_v4, %v1681_v24 }
 0x460   :  { %v1742_v6 = vsel %vm1741_vm4, %v1686_v57, %v1677_v22  ;;  %v1640_v2 = vpop.permute.xlu1 %1639  ;;  %v2441_v44 = vpop.permute.xlu0 %2440 }
 0x461   :  { %v1703_v16 = vrot.slane %v1640_v2, %v1674_v58  ;;  %v1744_v8 = vsel %vm1743_vm5, %v1695_v61, %v1742_v6  ;;  %v2472_v51 = vrot.slane %v2441_v44, %v2451_v32 }
 0x463   :  { %v1704_v39 = vsel %vm1676_vm3, %v1703_v16, %v1699_v3 }
 0x464   :  { %v1746_v45 = vsel %vm1745_vm6, %v1704_v39, %v1744_v8  ;;  %v1652_v12 = vpop.permute.xlu1 %1651 }
 0x465   :  { %v1721_v54 = vrot.slane %v1652_v12, %v1674_v58  ;;  %v1748_v13 = vsel %vm1747_vm7, %v1713_v36, %v1746_v45 }
 0x467   :  { %v1722_v60 = vsel %vm1676_vm3, %v1721_v54, %v1717_v11 }
 0x468   :  { %v1750_v18 = vsel %vm1749_vm8, %v1722_v60, %v1748_v13  ;;  %v1664_v56 = vpop.permute.xlu1 %1663 }
 0x469   :  { %v1739_v19 = vrot.slane %v1664_v56, %v1674_v58  ;;  %v1752_v20 = vsel %vm1751_vm9, %v1731_v15, %v1750_v18 }
 0x46b   :  { %v1740_v21 = vsel %vm1676_vm3, %v1739_v19, %v1735_v49 }
 0x46c   :  { %v1754_v25 = vsel %vm1753_vm10, %v1740_v21, %v1752_v20  ;;  %v2426_v27 = vpop.permute.xlu1 %2425 }
 0x46d   :  { %1757 = vst.msk [vmem:[#allocation20] sm:$0xff] %vm1756_vm11, %v1754_v25  ;;  %v2452_v37 = vrot.slane %v2426_v27, %v2451_v32 }
 0x470   :  { %v2429_v29 = vpop.permute.xlu1 %2428 }
 0x471   :  { %v2456_v31 = vrot.slane %v2429_v29, %v2451_v32 }
 0x473   :  { %v2481_v38 = vsel %vm1741_vm4, %v2456_v31, %v2452_v37 }
 0x474   :  { %v2432_v0 = vpop.permute.xlu1 %2431 }
 0x475   :  { %v2460_v28 = vrot.slane %v2432_v0, %v2451_v32 }
 0x477   :  { %v2482_v40 = vsel %vm1743_vm5, %v2460_v28, %v2481_v38 }
 0x478   :  { %v2438_v35 = vpop.permute.xlu1 %2437  ;;  %v2483_v17 = vsel %vm1745_vm6, %v2464_v42, %v2482_v40 }
 0x479   :  { %v2468_v41 = vrot.slane %v2438_v35, %v2451_v32 }
 0x47b   :  { %v2484_v48 = vsel %vm1747_vm7, %v2468_v41, %v2483_v17 }
 0x47c   :  { %v2444_v43 = vpop.permute.xlu1 %2443  ;;  %v2485_v52 = vsel %vm1749_vm8, %v2472_v51, %v2484_v48 }
 0x47d   :  { %v2476_v50 = vrot.slane %v2444_v43, %v2451_v32 }
 0x47f   :  { %v2486_v55 = vsel %vm1751_vm9, %v2476_v50, %v2485_v52 }
 0x4a1   :  { %v2447_v23 = vpop.permute.xlu0 %2446 }
 0x4a2   :  { %v2480_v53 = vrot.slane %v2447_v23, %v2451_v32 }
 0x4a4   :  { %v2487_v58 = vsel %vm1753_vm10, %v2480_v53, %v2486_v55 }
 0x4a5   :  { %2490 = vst.msk [vmem:[#allocation20] sm:$0xff] %vm2489_vm12, %v2487_v58 }
 0x4a6   :  { %2495 = vsyncadd [#allocation4], 96  ;;  %s2819_s8 = smov [#allocation20]  }
 0x4a7   :  { %s2496_s10 = sshll.u32 %s2819_s8, 4  ;;  %s2497_s10 = int_to_ptr.vmem [resolvable:$true] %s2496_s10 }
 0x4a8   :  { %s2763_s9 = scalar_lea.vmem %s2497_s10, 32  ;;  %s2767_s14 = scalar_lea.vmem %s2497_s10, 128 }
 0x4a9   :  { %p2764_p13 = scmp.ne.s32.totalorder %s2497_s10, %s2763_s9  ;;  %p2768_p0 = scmp.lt.s32.totalorder %s2497_s10, %s2497_s10 }
 0x4aa   :  { %p2769_p1 = scmp.lt.s32.totalorder %s2767_s14, %s2763_s9 }
 0x4ac   :  { %p2770_p2 = por %p2769_p1, %p2768_p0 }
 0x4ae   :  { %p2771_p3 = pnand %p2770_p2, %p2764_p13 }
 0x4b0   :  { %2774 = shalt.err (!%p2771_p3)
}
 0x4b1   :  { %2502 = dma.vmem_to_hbm [thread:$0]  %s2497_s10, 32, %s3176_s11, [#allocation4], %s2799_s21, %s2799_s21, %s2809_s7  }
 0x4b2   :  { %2795 = dma.done.wait [#allocation4], 128  }
 0x4b3   :  { %2796 = vsyncadd [#allocation4], 4294967168 }
 0x4b4   :  { %2506 = vsyncpa [#allocation3], 1 }
 0x4b5   :  { %2507 = vsyncpa [#allocation6], 1 }
 0x4b6   :  { %2508 = vsyncpa [#allocation9], 1 }
 0x4b7   :  { %2509 = vsyncpa [#allocation12], 1 }
 0x4b8   :  { %2510 = vsyncpa [#allocation15], 1 }
 0x4b9   :  { %2511 = vsyncpa [#allocation18], 1 }
 0x4ba   :  { %2512 = vsyncpa [#allocation4], 1 }

</bundles_post_ra>
